<compile_context>
chip_gen: v7x
topology: tpu7x:2x2x1
jax: 0.10.0
libtpu: 0.0.40
codegen_flags: <defaults>
</compile_context>

<pallas_src>
import functools

import jax
import jax.numpy as jnp
import numpy as np
from jax.experimental import pallas as pl
from jax.experimental.pallas import tpu as pltpu

EPS = 1e-5


def _banded_conv_matrix(w_hwio, W):
    """3x3 HWIO weights (3,3,Cin,Cout) -> banded (3*W*Cin, W*Cout) matrix.

    Row index = dy*(W*Cin) + w_in*Cin + ci, column = w_out*Cout + co.
    The dx taps and the width-direction zero padding are folded into the band
    structure, so the kernel never slices / rolls along the lane (W*C) axis.
    """
    kh, kw, cin, cout = w_hwio.shape
    # P[dx, w_in, w_out] = 1 iff w_in == w_out + dx - 1 and 0 <= w_in < W.
    P = np.zeros((kw, W, W), np.float32)
    for dx in range(kw):
        for wo in range(W):
            wi = wo + dx - 1
            if 0 <= wi < W:
                P[dx, wi, wo] = 1.0
    m = jnp.einsum("xvw,yxio->yviwo", P, w_hwio)        # (3, W, Cin, W, Cout)
    return m.reshape(kh * W * cin, W * cout)


def _block_diag_1x1_matrix(w_io, W):
    """1x1 conv weights (Cin, Cout) -> block-diagonal (W*Cin, W*Cout)."""
    cin, cout = w_io.shape
    eye = np.eye(W, dtype=np.float32)
    m = jnp.einsum("vw,io->viwo", eye, w_io)            # (W, Cin, W, Cout)
    return m.reshape(W * cin, W * cout)


def _make_residual_kernel(N, H, W, Cin, Cout, change):
    ROWS = N * H          # sublane extent of the dense slabs
    TOT = N * H * W       # elements per channel for the BN batch stats
    WCI = W * Cin
    WCO = W * Cout

    def zero_h_halo(pad_ref, wc):
        # Only the two H-halo rows need zeroing (there is no W halo).
        pad_ref[:, 0:1, :] = jnp.zeros((N, 1, wc), jnp.float32)
        pad_ref[:, H + 1:H + 2, :] = jnp.zeros((N, 1, wc), jnp.float32)

    def conv3x3(pad_ref, wmat_ref, wc):
        # Three dy taps (sublane-offset loads), concatenated along lanes, then
        # one MXU matmul against the banded weight matrix (dx folded in).
        taps = [pad_ref[:, dy:dy + H, :] for dy in range(3)]       # (N,H,wc) each
        p = jnp.concatenate(taps, axis=-1).reshape(ROWS, 3 * wc)   # (ROWS, 3*wc)
        return jnp.dot(p.astype(wmat_ref.dtype), wmat_ref[...],
                       preferred_element_type=jnp.float32)         # (ROWS, WCO)

    def wsum(row, C):
        # (1, W*C) -> (1, C): sum over the w lane-blocks (static lane slices).
        acc = row[:, 0:C]
        for w in range(1, W):
            acc = acc + row[:, w * C:(w + 1) * C]
        return acc

    def wtile(vec):
        # (1, C) -> (1, W*C): tile across the w lane-blocks.
        return jnp.concatenate([vec] * W, axis=-1)

    def bn_affine_relu(y, g_ref, be_ref, skip=None):
        # PyTorch training-mode BatchNorm (biased batch stats over N,H,W),
        # two-pass centered variance, then optional skip add and ReLU.
        s = jnp.sum(y, axis=0, keepdims=True)                      # (1, WCO)
        mean_c = wsum(s, Cout) / TOT                               # (1, Cout)
        d = y - wtile(mean_c)
        ss = jnp.sum(d * d, axis=0, keepdims=True)                 # (1, WCO)
        var_c = wsum(ss, Cout) / TOT                               # (1, Cout)
        scale_c = g_ref[...] * jax.lax.rsqrt(var_c + EPS)          # (1, Cout)
        out = d * wtile(scale_c) + wtile(be_ref[...])
        if skip is not None:
            out = out + skip
        return jnp.maximum(out, 0.0)

    def kernel(*refs):
        if change:
            (x_ref, w1_ref, g1_ref, be1_ref, w2_ref, g2_ref, be2_ref,
             w3_ref, b3_ref, out_ref, xpad_ref, ypad_ref) = refs
        else:
            (x_ref, w1_ref, g1_ref, be1_ref, w2_ref, g2_ref, be2_ref,
             out_ref, xpad_ref, ypad_ref) = refs

        # Stage x into the H-padded, lane-dense scratch (halo rows only).
        zero_h_halo(xpad_ref, WCI)
        xpad_ref[:, 1:H + 1, :] = x_ref[...]

        # conv1 (bias absorbed by BN1) -> BN1 -> ReLU.
        y1 = bn_affine_relu(conv3x3(xpad_ref, w1_ref, WCI), g1_ref, be1_ref)

        # Stage relu(bn1(conv1(x))) for conv2.
        zero_h_halo(ypad_ref, WCO)
        ypad_ref[:, 1:H + 1, :] = y1.reshape(N, H, WCO)

        # conv2 (bias absorbed by BN2).
        y2 = conv3x3(ypad_ref, w2_ref, WCO)

        # Skip path.
        x2d = x_ref[...].reshape(ROWS, WCI)
        if change:
            skip = jnp.dot(x2d.astype(w3_ref.dtype), w3_ref[...],
                           preferred_element_type=jnp.float32) + b3_ref[...]
        else:
            skip = x2d          # identity skip (Cin == Cout)

        # BN2 + skip + ReLU, stored as a dense (N*H, W*Cout) slab (unmasked vst).
        out_ref[...] = bn_affine_relu(y2, g2_ref, be2_ref, skip=skip)

    return kernel


@functools.partial(jax.jit, static_argnames=("change", "use_bf16"))
def residual_forward(x, params, change=False, use_bf16=True):
    """x: (N, H, W, Cin) float32 NHWC.  Returns (N, H, W, Cout)."""
    N, H, W, Cin = x.shape
    Cout = params["w1"].shape[-1]
    if not change and Cin != Cout:
        raise ValueError("change=False requires Cin == Cout (identity skip).")

    mxu_dtype = jnp.bfloat16 if use_bf16 else jnp.float32
    w1m = _banded_conv_matrix(params["w1"], W).astype(mxu_dtype)   # (3*W*Cin, W*Cout)
    w2m = _banded_conv_matrix(params["w2"], W).astype(mxu_dtype)   # (3*W*Cout, W*Cout)

    # Lane-dense input view (free reshape on the XLA side).
    x2d = x.reshape(N, H, W * Cin)

    # Note: b1/b2 are deliberately NOT passed -- training-mode BN absorbs them.
    args = [x2d, w1m, params["g1"], params["be1"], w2m, params["g2"], params["be2"]]
    if change:
        w3m = _block_diag_1x1_matrix(params["w3"], W).astype(mxu_dtype)
        b3l = jnp.tile(params["b3"], (1, W))                        # (1, W*Cout)
        args += [w3m, b3l]

    kernel = _make_residual_kernel(N, H, W, Cin, Cout, change)
    out2d = pl.pallas_call(
        kernel,
        out_shape=jax.ShapeDtypeStruct((N * H, W * Cout), jnp.float32),
        in_specs=[pl.BlockSpec(memory_space=pltpu.MemorySpace.VMEM)] * len(args),
        out_specs=pl.BlockSpec(memory_space=pltpu.MemorySpace.VMEM),
        scratch_shapes=[
            pltpu.VMEM((N, H + 2, W * Cin), jnp.float32),    # H-padded x
            pltpu.VMEM((N, H + 2, W * Cout), jnp.float32),   # H-padded relu(bn1)
        ],
        compiler_params=pltpu.CompilerParams(
            vmem_limit_bytes=32 * 1024 * 1024),
    )(*args)
    return out2d.reshape(N, H, W, Cout)


def residual_reference(x, params, change=False):
    """Pure-JAX reference (PyTorch training-mode semantics, incl. conv biases)."""
    def conv(x, w, b, pad):
        y = jax.lax.conv_general_dilated(
            x, w, window_strides=(1, 1), padding=[(pad, pad), (pad, pad)],
            dimension_numbers=("NHWC", "HWIO", "NHWC"))
        return y + b.reshape(1, 1, 1, -1)

    def bn(y, g, b):
        m = jnp.mean(y, axis=(0, 1, 2))
        v = jnp.mean((y - m) ** 2, axis=(0, 1, 2))
        return (y - m) * jax.lax.rsqrt(v + EPS) * g.reshape(-1) + b.reshape(-1)

    y = jax.nn.relu(bn(conv(x, params["w1"], params["b1"], 1),
                       params["g1"], params["be1"]))
    y = bn(conv(y, params["w2"], params["b2"], 1), params["g2"], params["be2"])
    if change:
        skip = conv(x, params["w3"].reshape(1, 1, *params["w3"].shape),
                    params["b3"], 0)
    else:
        skip = x
    return jax.nn.relu(y + skip)


def init_params(key, cin, cout, change):
    ks = jax.random.split(key, 10)
    p = {
        "w1": 0.2 * jax.random.normal(ks[0], (3, 3, cin, cout), jnp.float32),
        "b1": 0.1 * jax.random.normal(ks[1], (1, cout), jnp.float32),
        "g1": 1.0 + 0.1 * jax.random.normal(ks[2], (1, cout), jnp.float32),
        "be1": 0.1 * jax.random.normal(ks[3], (1, cout), jnp.float32),
        "w2": 0.2 * jax.random.normal(ks[4], (3, 3, cout, cout), jnp.float32),
        "b2": 0.1 * jax.random.normal(ks[5], (1, cout), jnp.float32),
        "g2": 1.0 + 0.1 * jax.random.normal(ks[6], (1, cout), jnp.float32),
        "be2": 0.1 * jax.random.normal(ks[7], (1, cout), jnp.float32),
    }
    if change:
        p["w3"] = 0.2 * jax.random.normal(ks[8], (cin, cout), jnp.float32)
        p["b3"] = 0.1 * jax.random.normal(ks[9], (1, cout), jnp.float32)
    return p


if __name__ == "__main__":
    key = jax.random.PRNGKey(0)
    k1, k2, k3, k4 = jax.random.split(key, 4)

    # Case 1: Residual(8, 8, change=False, strides=1) -- identity skip.
    x1 = jax.random.normal(k1, (2, 16, 16, 8), jnp.float32)     # NHWC
    p1 = init_params(k2, 8, 8, change=False)
    ref1 = np.asarray(residual_reference(x1, p1, change=False))

    out1_f32 = jax.block_until_ready(
        residual_forward(x1, p1, change=False, use_bf16=False))
    np.testing.assert_allclose(np.asarray(out1_f32), ref1, rtol=1e-4, atol=1e-4)
    out1 = jax.block_until_ready(
        residual_forward(x1, p1, change=False, use_bf16=True))
    # bf16 MXU operands (f32 accumulation) -> loosened tolerance.
    np.testing.assert_allclose(np.asarray(out1), ref1, rtol=5e-2, atol=5e-2)

    # Case 2: Residual(4, 8, change=True, strides=1) -- 1x1-conv skip.
    x2 = jax.random.normal(k3, (2, 16, 16, 4), jnp.float32)     # NHWC
    p2 = init_params(k4, 4, 8, change=True)
    ref2 = np.asarray(residual_reference(x2, p2, change=True))

    out2_f32 = jax.block_until_ready(
        residual_forward(x2, p2, change=True, use_bf16=False))
    np.testing.assert_allclose(np.asarray(out2_f32), ref2, rtol=1e-4, atol=1e-4)
    out2 = jax.block_until_ready(
        residual_forward(x2, p2, change=True, use_bf16=True))
    np.testing.assert_allclose(np.asarray(out2), ref2, rtol=5e-2, atol=5e-2)

    print("KERNEL_OK")
</pallas_src>

<mosaic_0001>
module attributes {stable_mosaic.version = 11 : i64} {
  func.func @kernel(%arg0: memref<2x16x128xf32, #tpu.memory_space<vmem>>, %arg1: memref<384x128xf32, #tpu.memory_space<vmem>>, %arg2: memref<1x8xf32, #tpu.memory_space<vmem>>, %arg3: memref<1x8xf32, #tpu.memory_space<vmem>>, %arg4: memref<384x128xf32, #tpu.memory_space<vmem>>, %arg5: memref<1x8xf32, #tpu.memory_space<vmem>>, %arg6: memref<1x8xf32, #tpu.memory_space<vmem>>, %arg7: memref<32x128xf32, #tpu.memory_space<vmem>>, %arg8: memref<2x18x128xf32, #tpu.memory_space<vmem>>, %arg9: memref<2x18x128xf32, #tpu.memory_space<vmem>>) attributes {dimension_semantics = [], scalar_prefetch = 0 : i64, scratch_operands = 2 : i64, tpu.core_type = #tpu.core_type<tc>} {
    %cst = arith.constant 0.000000e+00 : f32
    %0 = vector.broadcast %cst : f32 to vector<2x1x128xf32>
    %c0 = arith.constant 0 : index
    %c0_0 = arith.constant 0 : index
    %c0_1 = arith.constant 0 : index
    %1 = vector.load %arg8[%c0, %c0_0, %c0_1] : memref<2x18x128xf32, #tpu.memory_space<vmem>>, vector<2x1x128xf32>
    tpu.vector_store %arg8[%c0, %c0_0, %c0_1], %0 {strides = array<i32>} : memref<2x18x128xf32, #tpu.memory_space<vmem>>, vector<2x1x128xf32>,
    %cst_2 = arith.constant 0.000000e+00 : f32
    %2 = vector.broadcast %cst_2 : f32 to vector<2x1x128xf32>
    %c0_3 = arith.constant 0 : index
    %c17 = arith.constant 17 : index
    %c0_4 = arith.constant 0 : index
    %3 = vector.load %arg8[%c0_3, %c17, %c0_4] : memref<2x18x128xf32, #tpu.memory_space<vmem>>, vector<2x1x128xf32>
    tpu.vector_store %arg8[%c0_3, %c17, %c0_4], %2 {strides = array<i32>} : memref<2x18x128xf32, #tpu.memory_space<vmem>>, vector<2x1x128xf32>,
    %c0_5 = arith.constant 0 : index
    %c0_6 = arith.constant 0 : index
    %c0_7 = arith.constant 0 : index
    %4 = vector.load %arg0[%c0_5, %c0_6, %c0_7] : memref<2x16x128xf32, #tpu.memory_space<vmem>>, vector<2x16x128xf32>
    %c0_8 = arith.constant 0 : index
    %c1 = arith.constant 1 : index
    %c0_9 = arith.constant 0 : index
    %5 = vector.load %arg8[%c0_8, %c1, %c0_9] : memref<2x18x128xf32, #tpu.memory_space<vmem>>, vector<2x16x128xf32>
    tpu.vector_store %arg8[%c0_8, %c1, %c0_9], %4 {strides = array<i32>} : memref<2x18x128xf32, #tpu.memory_space<vmem>>, vector<2x16x128xf32>,
    %c0_10 = arith.constant 0 : index
    %c0_11 = arith.constant 0 : index
    %c0_12 = arith.constant 0 : index
    %6 = vector.load %arg8[%c0_10, %c0_11, %c0_12] : memref<2x18x128xf32, #tpu.memory_space<vmem>>, vector<2x16x128xf32>
    %c0_13 = arith.constant 0 : index
    %c1_14 = arith.constant 1 : index
    %c0_15 = arith.constant 0 : index
    %7 = vector.load %arg8[%c0_13, %c1_14, %c0_15] : memref<2x18x128xf32, #tpu.memory_space<vmem>>, vector<2x16x128xf32>
    %c0_16 = arith.constant 0 : index
    %c2 = arith.constant 2 : index
    %c0_17 = arith.constant 0 : index
    %8 = vector.load %arg8[%c0_16, %c2, %c0_17] : memref<2x18x128xf32, #tpu.memory_space<vmem>>, vector<2x16x128xf32>
    %9 = tpu.concatenate %6, %7, %8 in 2 : vector<2x16x128xf32>, vector<2x16x128xf32>, vector<2x16x128xf32> -> vector<2x16x384xf32>
    %10 = vector.shape_cast %9 : vector<2x16x384xf32> to vector<32x384xf32>
    %c0_18 = arith.constant 0 : index
    %c0_19 = arith.constant 0 : index
    %11 = vector.load %arg1[%c0_18, %c0_19] : memref<384x128xf32, #tpu.memory_space<vmem>>, vector<384x128xf32>
    %cst_20 = arith.constant dense<0.000000e+00> : vector<32x128xf32>
    %12 = tpu.matmul %10, %11, %cst_20 {dimension_numbers = #tpu.dot_dimension_numbers<[1], [0], [0], [1], [0, 0, 1, 1], [], []>} : vector<32x384xf32>, vector<384x128xf32>, vector<32x128xf32> -> vector<32x128xf32>
    %cst_21 = arith.constant dense<0.000000e+00> : vector<128xf32>
    %13 = vector.multi_reduction <add>, %12, %cst_21 [0] : vector<32x128xf32> to vector<128xf32>
    %14 = vector.shape_cast %13 : vector<128xf32> to vector<1x128xf32>
    %15 = vector.extract_strided_slice %14 {offsets = [0, 0], sizes = [1, 8], strides = [1, 1]} : vector<1x128xf32> to vector<1x8xf32>
    %16 = vector.extract_strided_slice %14 {offsets = [0, 8], sizes = [1, 8], strides = [1, 1]} : vector<1x128xf32> to vector<1x8xf32>
    %17 = arith.addf %15, %16 : vector<1x8xf32>
    %18 = vector.extract_strided_slice %14 {offsets = [0, 16], sizes = [1, 8], strides = [1, 1]} : vector<1x128xf32> to vector<1x8xf32>
    %19 = arith.addf %17, %18 : vector<1x8xf32>
    %20 = vector.extract_strided_slice %14 {offsets = [0, 24], sizes = [1, 8], strides = [1, 1]} : vector<1x128xf32> to vector<1x8xf32>
    %21 = arith.addf %19, %20 : vector<1x8xf32>
    %22 = vector.extract_strided_slice %14 {offsets = [0, 32], sizes = [1, 8], strides = [1, 1]} : vector<1x128xf32> to vector<1x8xf32>
    %23 = arith.addf %21, %22 : vector<1x8xf32>
    %24 = vector.extract_strided_slice %14 {offsets = [0, 40], sizes = [1, 8], strides = [1, 1]} : vector<1x128xf32> to vector<1x8xf32>
    %25 = arith.addf %23, %24 : vector<1x8xf32>
    %26 = vector.extract_strided_slice %14 {offsets = [0, 48], sizes = [1, 8], strides = [1, 1]} : vector<1x128xf32> to vector<1x8xf32>
    %27 = arith.addf %25, %26 : vector<1x8xf32>
    %28 = vector.extract_strided_slice %14 {offsets = [0, 56], sizes = [1, 8], strides = [1, 1]} : vector<1x128xf32> to vector<1x8xf32>
    %29 = arith.addf %27, %28 : vector<1x8xf32>
    %30 = vector.extract_strided_slice %14 {offsets = [0, 64], sizes = [1, 8], strides = [1, 1]} : vector<1x128xf32> to vector<1x8xf32>
    %31 = arith.addf %29, %30 : vector<1x8xf32>
    %32 = vector.extract_strided_slice %14 {offsets = [0, 72], sizes = [1, 8], strides = [1, 1]} : vector<1x128xf32> to vector<1x8xf32>
    %33 = arith.addf %31, %32 : vector<1x8xf32>
    %34 = vector.extract_strided_slice %14 {offsets = [0, 80], sizes = [1, 8], strides = [1, 1]} : vector<1x128xf32> to vector<1x8xf32>
    %35 = arith.addf %33, %34 : vector<1x8xf32>
    %36 = vector.extract_strided_slice %14 {offsets = [0, 88], sizes = [1, 8], strides = [1, 1]} : vector<1x128xf32> to vector<1x8xf32>
    %37 = arith.addf %35, %36 : vector<1x8xf32>
    %38 = vector.extract_strided_slice %14 {offsets = [0, 96], sizes = [1, 8], strides = [1, 1]} : vector<1x128xf32> to vector<1x8xf32>
    %39 = arith.addf %37, %38 : vector<1x8xf32>
    %40 = vector.extract_strided_slice %14 {offsets = [0, 104], sizes = [1, 8], strides = [1, 1]} : vector<1x128xf32> to vector<1x8xf32>
    %41 = arith.addf %39, %40 : vector<1x8xf32>
    %42 = vector.extract_strided_slice %14 {offsets = [0, 112], sizes = [1, 8], strides = [1, 1]} : vector<1x128xf32> to vector<1x8xf32>
    %43 = arith.addf %41, %42 : vector<1x8xf32>
    %44 = vector.extract_strided_slice %14 {offsets = [0, 120], sizes = [1, 8], strides = [1, 1]} : vector<1x128xf32> to vector<1x8xf32>
    %45 = arith.addf %43, %44 : vector<1x8xf32>
    %cst_22 = arith.constant 5.120000e+02 : f32
    %46 = vector.broadcast %cst_22 : f32 to vector<1x8xf32>
    %47 = arith.divf %45, %46 : vector<1x8xf32>
    %48 = tpu.concatenate %47, %47, %47, %47, %47, %47, %47, %47, %47, %47, %47, %47, %47, %47, %47, %47 in 1 : vector<1x8xf32>, vector<1x8xf32>, vector<1x8xf32>, vector<1x8xf32>, vector<1x8xf32>, vector<1x8xf32>, vector<1x8xf32>, vector<1x8xf32>, vector<1x8xf32>, vector<1x8xf32>, vector<1x8xf32>, vector<1x8xf32>, vector<1x8xf32>, vector<1x8xf32>, vector<1x8xf32>, vector<1x8xf32> -> vector<1x128xf32>
    %49 = vector.broadcast %48 : vector<1x128xf32> to vector<32x128xf32>
    %50 = arith.subf %12, %49 : vector<32x128xf32>
    %51 = arith.mulf %50, %50 : vector<32x128xf32>
    %cst_23 = arith.constant dense<0.000000e+00> : vector<128xf32>
    %52 = vector.multi_reduction <add>, %51, %cst_23 [0] : vector<32x128xf32> to vector<128xf32>
    %53 = vector.shape_cast %52 : vector<128xf32> to vector<1x128xf32>
    %54 = vector.extract_strided_slice %53 {offsets = [0, 0], sizes = [1, 8], strides = [1, 1]} : vector<1x128xf32> to vector<1x8xf32>
    %55 = vector.extract_strided_slice %53 {offsets = [0, 8], sizes = [1, 8], strides = [1, 1]} : vector<1x128xf32> to vector<1x8xf32>
    %56 = arith.addf %54, %55 : vector<1x8xf32>
    %57 = vector.extract_strided_slice %53 {offsets = [0, 16], sizes = [1, 8], strides = [1, 1]} : vector<1x128xf32> to vector<1x8xf32>
    %58 = arith.addf %56, %57 : vector<1x8xf32>
    %59 = vector.extract_strided_slice %53 {offsets = [0, 24], sizes = [1, 8], strides = [1, 1]} : vector<1x128xf32> to vector<1x8xf32>
    %60 = arith.addf %58, %59 : vector<1x8xf32>
    %61 = vector.extract_strided_slice %53 {offsets = [0, 32], sizes = [1, 8], strides = [1, 1]} : vector<1x128xf32> to vector<1x8xf32>
    %62 = arith.addf %60, %61 : vector<1x8xf32>
    %63 = vector.extract_strided_slice %53 {offsets = [0, 40], sizes = [1, 8], strides = [1, 1]} : vector<1x128xf32> to vector<1x8xf32>
    %64 = arith.addf %62, %63 : vector<1x8xf32>
    %65 = vector.extract_strided_slice %53 {offsets = [0, 48], sizes = [1, 8], strides = [1, 1]} : vector<1x128xf32> to vector<1x8xf32>
    %66 = arith.addf %64, %65 : vector<1x8xf32>
    %67 = vector.extract_strided_slice %53 {offsets = [0, 56], sizes = [1, 8], strides = [1, 1]} : vector<1x128xf32> to vector<1x8xf32>
    %68 = arith.addf %66, %67 : vector<1x8xf32>
    %69 = vector.extract_strided_slice %53 {offsets = [0, 64], sizes = [1, 8], strides = [1, 1]} : vector<1x128xf32> to vector<1x8xf32>
    %70 = arith.addf %68, %69 : vector<1x8xf32>
    %71 = vector.extract_strided_slice %53 {offsets = [0, 72], sizes = [1, 8], strides = [1, 1]} : vector<1x128xf32> to vector<1x8xf32>
    %72 = arith.addf %70, %71 : vector<1x8xf32>
    %73 = vector.extract_strided_slice %53 {offsets = [0, 80], sizes = [1, 8], strides = [1, 1]} : vector<1x128xf32> to vector<1x8xf32>
    %74 = arith.addf %72, %73 : vector<1x8xf32>
    %75 = vector.extract_strided_slice %53 {offsets = [0, 88], sizes = [1, 8], strides = [1, 1]} : vector<1x128xf32> to vector<1x8xf32>
    %76 = arith.addf %74, %75 : vector<1x8xf32>
    %77 = vector.extract_strided_slice %53 {offsets = [0, 96], sizes = [1, 8], strides = [1, 1]} : vector<1x128xf32> to vector<1x8xf32>
    %78 = arith.addf %76, %77 : vector<1x8xf32>
    %79 = vector.extract_strided_slice %53 {offsets = [0, 104], sizes = [1, 8], strides = [1, 1]} : vector<1x128xf32> to vector<1x8xf32>
    %80 = arith.addf %78, %79 : vector<1x8xf32>
    %81 = vector.extract_strided_slice %53 {offsets = [0, 112], sizes = [1, 8], strides = [1, 1]} : vector<1x128xf32> to vector<1x8xf32>
    %82 = arith.addf %80, %81 : vector<1x8xf32>
    %83 = vector.extract_strided_slice %53 {offsets = [0, 120], sizes = [1, 8], strides = [1, 1]} : vector<1x128xf32> to vector<1x8xf32>
    %84 = arith.addf %82, %83 : vector<1x8xf32>
    %cst_24 = arith.constant 5.120000e+02 : f32
    %85 = vector.broadcast %cst_24 : f32 to vector<1x8xf32>
    %86 = arith.divf %84, %85 : vector<1x8xf32>
    %c0_25 = arith.constant 0 : index
    %c0_26 = arith.constant 0 : index
    %87 = vector.load %arg2[%c0_25, %c0_26] : memref<1x8xf32, #tpu.memory_space<vmem>>, vector<1x8xf32>
    %cst_27 = arith.constant 9.99999974E-6 : f32
    %88 = vector.broadcast %cst_27 : f32 to vector<1x8xf32>
    %89 = arith.addf %86, %88 : vector<1x8xf32>
    %90 = math.rsqrt %89 : vector<1x8xf32>
    %91 = arith.mulf %87, %90 : vector<1x8xf32>
    %92 = tpu.concatenate %91, %91, %91, %91, %91, %91, %91, %91, %91, %91, %91, %91, %91, %91, %91, %91 in 1 : vector<1x8xf32>, vector<1x8xf32>, vector<1x8xf32>, vector<1x8xf32>, vector<1x8xf32>, vector<1x8xf32>, vector<1x8xf32>, vector<1x8xf32>, vector<1x8xf32>, vector<1x8xf32>, vector<1x8xf32>, vector<1x8xf32>, vector<1x8xf32>, vector<1x8xf32>, vector<1x8xf32>, vector<1x8xf32> -> vector<1x128xf32>
    %93 = vector.broadcast %92 : vector<1x128xf32> to vector<32x128xf32>
    %94 = arith.mulf %50, %93 : vector<32x128xf32>
    %c0_28 = arith.constant 0 : index
    %c0_29 = arith.constant 0 : index
    %95 = vector.load %arg3[%c0_28, %c0_29] : memref<1x8xf32, #tpu.memory_space<vmem>>, vector<1x8xf32>
    %96 = tpu.concatenate %95, %95, %95, %95, %95, %95, %95, %95, %95, %95, %95, %95, %95, %95, %95, %95 in 1 : vector<1x8xf32>, vector<1x8xf32>, vector<1x8xf32>, vector<1x8xf32>, vector<1x8xf32>, vector<1x8xf32>, vector<1x8xf32>, vector<1x8xf32>, vector<1x8xf32>, vector<1x8xf32>, vector<1x8xf32>, vector<1x8xf32>, vector<1x8xf32>, vector<1x8xf32>, vector<1x8xf32>, vector<1x8xf32> -> vector<1x128xf32>
    %97 = vector.broadcast %96 : vector<1x128xf32> to vector<32x128xf32>
    %98 = arith.addf %94, %97 : vector<32x128xf32>
    %cst_30 = arith.constant 0.000000e+00 : f32
    %99 = vector.broadcast %cst_30 : f32 to vector<32x128xf32>
    %100 = arith.maximumf %98, %99 : vector<32x128xf32>
    %cst_31 = arith.constant 0.000000e+00 : f32
    %101 = vector.broadcast %cst_31 : f32 to vector<2x1x128xf32>
    %c0_32 = arith.constant 0 : index
    %c0_33 = arith.constant 0 : index
    %c0_34 = arith.constant 0 : index
    %102 = vector.load %arg9[%c0_32, %c0_33, %c0_34] : memref<2x18x128xf32, #tpu.memory_space<vmem>>, vector<2x1x128xf32>
    tpu.vector_store %arg9[%c0_32, %c0_33, %c0_34], %101 {strides = array<i32>} : memref<2x18x128xf32, #tpu.memory_space<vmem>>, vector<2x1x128xf32>,
    %cst_35 = arith.constant 0.000000e+00 : f32
    %103 = vector.broadcast %cst_35 : f32 to vector<2x1x128xf32>
    %c0_36 = arith.constant 0 : index
    %c17_37 = arith.constant 17 : index
    %c0_38 = arith.constant 0 : index
    %104 = vector.load %arg9[%c0_36, %c17_37, %c0_38] : memref<2x18x128xf32, #tpu.memory_space<vmem>>, vector<2x1x128xf32>
    tpu.vector_store %arg9[%c0_36, %c17_37, %c0_38], %103 {strides = array<i32>} : memref<2x18x128xf32, #tpu.memory_space<vmem>>, vector<2x1x128xf32>,
    %105 = vector.shape_cast %100 : vector<32x128xf32> to vector<2x16x128xf32>
    %c0_39 = arith.constant 0 : index
    %c1_40 = arith.constant 1 : index
    %c0_41 = arith.constant 0 : index
    %106 = vector.load %arg9[%c0_39, %c1_40, %c0_41] : memref<2x18x128xf32, #tpu.memory_space<vmem>>, vector<2x16x128xf32>
    tpu.vector_store %arg9[%c0_39, %c1_40, %c0_41], %105 {strides = array<i32>} : memref<2x18x128xf32, #tpu.memory_space<vmem>>, vector<2x16x128xf32>,
    %c0_42 = arith.constant 0 : index
    %c0_43 = arith.constant 0 : index
    %c0_44 = arith.constant 0 : index
    %107 = vector.load %arg9[%c0_42, %c0_43, %c0_44] : memref<2x18x128xf32, #tpu.memory_space<vmem>>, vector<2x16x128xf32>
    %c0_45 = arith.constant 0 : index
    %c1_46 = arith.constant 1 : index
    %c0_47 = arith.constant 0 : index
    %108 = vector.load %arg9[%c0_45, %c1_46, %c0_47] : memref<2x18x128xf32, #tpu.memory_space<vmem>>, vector<2x16x128xf32>
    %c0_48 = arith.constant 0 : index
    %c2_49 = arith.constant 2 : index
    %c0_50 = arith.constant 0 : index
    %109 = vector.load %arg9[%c0_48, %c2_49, %c0_50] : memref<2x18x128xf32, #tpu.memory_space<vmem>>, vector<2x16x128xf32>
    %110 = tpu.concatenate %107, %108, %109 in 2 : vector<2x16x128xf32>, vector<2x16x128xf32>, vector<2x16x128xf32> -> vector<2x16x384xf32>
    %111 = vector.shape_cast %110 : vector<2x16x384xf32> to vector<32x384xf32>
    %c0_51 = arith.constant 0 : index
    %c0_52 = arith.constant 0 : index
    %112 = vector.load %arg4[%c0_51, %c0_52] : memref<384x128xf32, #tpu.memory_space<vmem>>, vector<384x128xf32>
    %cst_53 = arith.constant dense<0.000000e+00> : vector<32x128xf32>
    %113 = tpu.matmul %111, %112, %cst_53 {dimension_numbers = #tpu.dot_dimension_numbers<[1], [0], [0], [1], [0, 0, 1, 1], [], []>} : vector<32x384xf32>, vector<384x128xf32>, vector<32x128xf32> -> vector<32x128xf32>
    %c0_54 = arith.constant 0 : index
    %c0_55 = arith.constant 0 : index
    %c0_56 = arith.constant 0 : index
    %114 = vector.load %arg0[%c0_54, %c0_55, %c0_56] : memref<2x16x128xf32, #tpu.memory_space<vmem>>, vector<2x16x128xf32>
    %115 = vector.shape_cast %114 : vector<2x16x128xf32> to vector<32x128xf32>
    %cst_57 = arith.constant dense<0.000000e+00> : vector<128xf32>
    %116 = vector.multi_reduction <add>, %113, %cst_57 [0] : vector<32x128xf32> to vector<128xf32>
    %117 = vector.shape_cast %116 : vector<128xf32> to vector<1x128xf32>
    %118 = vector.extract_strided_slice %117 {offsets = [0, 0], sizes = [1, 8], strides = [1, 1]} : vector<1x128xf32> to vector<1x8xf32>
    %119 = vector.extract_strided_slice %117 {offsets = [0, 8], sizes = [1, 8], strides = [1, 1]} : vector<1x128xf32> to vector<1x8xf32>
    %120 = arith.addf %118, %119 : vector<1x8xf32>
    %121 = vector.extract_strided_slice %117 {offsets = [0, 16], sizes = [1, 8], strides = [1, 1]} : vector<1x128xf32> to vector<1x8xf32>
    %122 = arith.addf %120, %121 : vector<1x8xf32>
    %123 = vector.extract_strided_slice %117 {offsets = [0, 24], sizes = [1, 8], strides = [1, 1]} : vector<1x128xf32> to vector<1x8xf32>
    %124 = arith.addf %122, %123 : vector<1x8xf32>
    %125 = vector.extract_strided_slice %117 {offsets = [0, 32], sizes = [1, 8], strides = [1, 1]} : vector<1x128xf32> to vector<1x8xf32>
    %126 = arith.addf %124, %125 : vector<1x8xf32>
    %127 = vector.extract_strided_slice %117 {offsets = [0, 40], sizes = [1, 8], strides = [1, 1]} : vector<1x128xf32> to vector<1x8xf32>
    %128 = arith.addf %126, %127 : vector<1x8xf32>
    %129 = vector.extract_strided_slice %117 {offsets = [0, 48], sizes = [1, 8], strides = [1, 1]} : vector<1x128xf32> to vector<1x8xf32>
    %130 = arith.addf %128, %129 : vector<1x8xf32>
    %131 = vector.extract_strided_slice %117 {offsets = [0, 56], sizes = [1, 8], strides = [1, 1]} : vector<1x128xf32> to vector<1x8xf32>
    %132 = arith.addf %130, %131 : vector<1x8xf32>
    %133 = vector.extract_strided_slice %117 {offsets = [0, 64], sizes = [1, 8], strides = [1, 1]} : vector<1x128xf32> to vector<1x8xf32>
    %134 = arith.addf %132, %133 : vector<1x8xf32>
    %135 = vector.extract_strided_slice %117 {offsets = [0, 72], sizes = [1, 8], strides = [1, 1]} : vector<1x128xf32> to vector<1x8xf32>
    %136 = arith.addf %134, %135 : vector<1x8xf32>
    %137 = vector.extract_strided_slice %117 {offsets = [0, 80], sizes = [1, 8], strides = [1, 1]} : vector<1x128xf32> to vector<1x8xf32>
    %138 = arith.addf %136, %137 : vector<1x8xf32>
    %139 = vector.extract_strided_slice %117 {offsets = [0, 88], sizes = [1, 8], strides = [1, 1]} : vector<1x128xf32> to vector<1x8xf32>
    %140 = arith.addf %138, %139 : vector<1x8xf32>
    %141 = vector.extract_strided_slice %117 {offsets = [0, 96], sizes = [1, 8], strides = [1, 1]} : vector<1x128xf32> to vector<1x8xf32>
    %142 = arith.addf %140, %141 : vector<1x8xf32>
    %143 = vector.extract_strided_slice %117 {offsets = [0, 104], sizes = [1, 8], strides = [1, 1]} : vector<1x128xf32> to vector<1x8xf32>
    %144 = arith.addf %142, %143 : vector<1x8xf32>
    %145 = vector.extract_strided_slice %117 {offsets = [0, 112], sizes = [1, 8], strides = [1, 1]} : vector<1x128xf32> to vector<1x8xf32>
    %146 = arith.addf %144, %145 : vector<1x8xf32>
    %147 = vector.extract_strided_slice %117 {offsets = [0, 120], sizes = [1, 8], strides = [1, 1]} : vector<1x128xf32> to vector<1x8xf32>
    %148 = arith.addf %146, %147 : vector<1x8xf32>
    %cst_58 = arith.constant 5.120000e+02 : f32
    %149 = vector.broadcast %cst_58 : f32 to vector<1x8xf32>
    %150 = arith.divf %148, %149 : vector<1x8xf32>
    %151 = tpu.concatenate %150, %150, %150, %150, %150, %150, %150, %150, %150, %150, %150, %150, %150, %150, %150, %150 in 1 : vector<1x8xf32>, vector<1x8xf32>, vector<1x8xf32>, vector<1x8xf32>, vector<1x8xf32>, vector<1x8xf32>, vector<1x8xf32>, vector<1x8xf32>, vector<1x8xf32>, vector<1x8xf32>, vector<1x8xf32>, vector<1x8xf32>, vector<1x8xf32>, vector<1x8xf32>, vector<1x8xf32>, vector<1x8xf32> -> vector<1x128xf32>
    %152 = vector.broadcast %151 : vector<1x128xf32> to vector<32x128xf32>
    %153 = arith.subf %113, %152 : vector<32x128xf32>
    %154 = arith.mulf %153, %153 : vector<32x128xf32>
    %cst_59 = arith.constant dense<0.000000e+00> : vector<128xf32>
    %155 = vector.multi_reduction <add>, %154, %cst_59 [0] : vector<32x128xf32> to vector<128xf32>
    %156 = vector.shape_cast %155 : vector<128xf32> to vector<1x128xf32>
    %157 = vector.extract_strided_slice %156 {offsets = [0, 0], sizes = [1, 8], strides = [1, 1]} : vector<1x128xf32> to vector<1x8xf32>
    %158 = vector.extract_strided_slice %156 {offsets = [0, 8], sizes = [1, 8], strides = [1, 1]} : vector<1x128xf32> to vector<1x8xf32>
    %159 = arith.addf %157, %158 : vector<1x8xf32>
    %160 = vector.extract_strided_slice %156 {offsets = [0, 16], sizes = [1, 8], strides = [1, 1]} : vector<1x128xf32> to vector<1x8xf32>
    %161 = arith.addf %159, %160 : vector<1x8xf32>
    %162 = vector.extract_strided_slice %156 {offsets = [0, 24], sizes = [1, 8], strides = [1, 1]} : vector<1x128xf32> to vector<1x8xf32>
    %163 = arith.addf %161, %162 : vector<1x8xf32>
    %164 = vector.extract_strided_slice %156 {offsets = [0, 32], sizes = [1, 8], strides = [1, 1]} : vector<1x128xf32> to vector<1x8xf32>
    %165 = arith.addf %163, %164 : vector<1x8xf32>
    %166 = vector.extract_strided_slice %156 {offsets = [0, 40], sizes = [1, 8], strides = [1, 1]} : vector<1x128xf32> to vector<1x8xf32>
    %167 = arith.addf %165, %166 : vector<1x8xf32>
    %168 = vector.extract_strided_slice %156 {offsets = [0, 48], sizes = [1, 8], strides = [1, 1]} : vector<1x128xf32> to vector<1x8xf32>
    %169 = arith.addf %167, %168 : vector<1x8xf32>
    %170 = vector.extract_strided_slice %156 {offsets = [0, 56], sizes = [1, 8], strides = [1, 1]} : vector<1x128xf32> to vector<1x8xf32>
    %171 = arith.addf %169, %170 : vector<1x8xf32>
    %172 = vector.extract_strided_slice %156 {offsets = [0, 64], sizes = [1, 8], strides = [1, 1]} : vector<1x128xf32> to vector<1x8xf32>
    %173 = arith.addf %171, %172 : vector<1x8xf32>
    %174 = vector.extract_strided_slice %156 {offsets = [0, 72], sizes = [1, 8], strides = [1, 1]} : vector<1x128xf32> to vector<1x8xf32>
    %175 = arith.addf %173, %174 : vector<1x8xf32>
    %176 = vector.extract_strided_slice %156 {offsets = [0, 80], sizes = [1, 8], strides = [1, 1]} : vector<1x128xf32> to vector<1x8xf32>
    %177 = arith.addf %175, %176 : vector<1x8xf32>
    %178 = vector.extract_strided_slice %156 {offsets = [0, 88], sizes = [1, 8], strides = [1, 1]} : vector<1x128xf32> to vector<1x8xf32>
    %179 = arith.addf %177, %178 : vector<1x8xf32>
    %180 = vector.extract_strided_slice %156 {offsets = [0, 96], sizes = [1, 8], strides = [1, 1]} : vector<1x128xf32> to vector<1x8xf32>
    %181 = arith.addf %179, %180 : vector<1x8xf32>
    %182 = vector.extract_strided_slice %156 {offsets = [0, 104], sizes = [1, 8], strides = [1, 1]} : vector<1x128xf32> to vector<1x8xf32>
    %183 = arith.addf %181, %182 : vector<1x8xf32>
    %184 = vector.extract_strided_slice %156 {offsets = [0, 112], sizes = [1, 8], strides = [1, 1]} : vector<1x128xf32> to vector<1x8xf32>
    %185 = arith.addf %183, %184 : vector<1x8xf32>
    %186 = vector.extract_strided_slice %156 {offsets = [0, 120], sizes = [1, 8], strides = [1, 1]} : vector<1x128xf32> to vector<1x8xf32>
    %187 = arith.addf %185, %186 : vector<1x8xf32>
    %cst_60 = arith.constant 5.120000e+02 : f32
    %188 = vector.broadcast %cst_60 : f32 to vector<1x8xf32>
    %189 = arith.divf %187, %188 : vector<1x8xf32>
    %c0_61 = arith.constant 0 : index
    %c0_62 = arith.constant 0 : index
    %190 = vector.load %arg5[%c0_61, %c0_62] : memref<1x8xf32, #tpu.memory_space<vmem>>, vector<1x8xf32>
    %cst_63 = arith.constant 9.99999974E-6 : f32
    %191 = vector.broadcast %cst_63 : f32 to vector<1x8xf32>
    %192 = arith.addf %189, %191 : vector<1x8xf32>
    %193 = math.rsqrt %192 : vector<1x8xf32>
    %194 = arith.mulf %190, %193 : vector<1x8xf32>
    %195 = tpu.concatenate %194, %194, %194, %194, %194, %194, %194, %194, %194, %194, %194, %194, %194, %194, %194, %194 in 1 : vector<1x8xf32>, vector<1x8xf32>, vector<1x8xf32>, vector<1x8xf32>, vector<1x8xf32>, vector<1x8xf32>, vector<1x8xf32>, vector<1x8xf32>, vector<1x8xf32>, vector<1x8xf32>, vector<1x8xf32>, vector<1x8xf32>, vector<1x8xf32>, vector<1x8xf32>, vector<1x8xf32>, vector<1x8xf32> -> vector<1x128xf32>
    %196 = vector.broadcast %195 : vector<1x128xf32> to vector<32x128xf32>
    %197 = arith.mulf %153, %196 : vector<32x128xf32>
    %c0_64 = arith.constant 0 : index
    %c0_65 = arith.constant 0 : index
    %198 = vector.load %arg6[%c0_64, %c0_65] : memref<1x8xf32, #tpu.memory_space<vmem>>, vector<1x8xf32>
    %199 = tpu.concatenate %198, %198, %198, %198, %198, %198, %198, %198, %198, %198, %198, %198, %198, %198, %198, %198 in 1 : vector<1x8xf32>, vector<1x8xf32>, vector<1x8xf32>, vector<1x8xf32>, vector<1x8xf32>, vector<1x8xf32>, vector<1x8xf32>, vector<1x8xf32>, vector<1x8xf32>, vector<1x8xf32>, vector<1x8xf32>, vector<1x8xf32>, vector<1x8xf32>, vector<1x8xf32>, vector<1x8xf32>, vector<1x8xf32> -> vector<1x128xf32>
    %200 = vector.broadcast %199 : vector<1x128xf32> to vector<32x128xf32>
    %201 = arith.addf %197, %200 : vector<32x128xf32>
    %202 = arith.addf %201, %115 : vector<32x128xf32>
    %cst_66 = arith.constant 0.000000e+00 : f32
    %203 = vector.broadcast %cst_66 : f32 to vector<32x128xf32>
    %204 = arith.maximumf %202, %203 : vector<32x128xf32>
    %c0_67 = arith.constant 0 : index
    %c0_68 = arith.constant 0 : index
    %205 = vector.load %arg7[%c0_67, %c0_68] : memref<32x128xf32, #tpu.memory_space<vmem>>, vector<32x128xf32>
    tpu.vector_store %arg7[%c0_67, %c0_68], %204 {strides = array<i32>} : memref<32x128xf32, #tpu.memory_space<vmem>>, vector<32x128xf32>,
    return
  }
}

</mosaic_0001>

<bundles_post_ra>
// kernel: residual_forward.1
= control target key start
LH: loop header
LB: loop body
LE: loop exit
PB: predicated region body
PF: predicated region fallthrough
CT: control target
= control target key end

     0   :  { %v1630_v3 = vmov 0.0   ;;  %s1632_s13 = smov 120   ;;  %s1633_s14 = smov 96   ;;  %vm386_vm0 = vcmask 64512   ;;  %vm388_vm1 = vcmask 130048   ;;  %vm390_vm2 = vcmask 195584   ;;  %s2409_s1 = inlined_call_operand.vmem [shape: f32[384,128], index: 1, kind: input, shape index: {}]   ;;  %s2410_s0 = inlined_call_operand.vmem [shape: f32[2,16,128], index: 0, kind: input, shape index: {}]   ;;  %s2411_s3 = inlined_call_operand.vmem [shape: f32[1,8], index: 3, kind: input, shape index: {}]   ;;  %s2412_s2 = inlined_call_operand.vmem [shape: f32[1,8], index: 2, kind: input, shape index: {}]   ;;  %s2413_s4 = inlined_call_operand.vmem [shape: f32[384,128], index: 4, kind: input, shape index: {}]   ;;  %s2414_s6 = inlined_call_operand.vmem [shape: f32[1,8], index: 6, kind: input, shape index: {}]   ;;  %s2415_s5 = inlined_call_operand.vmem [shape: f32[1,8], index: 5, kind: input, shape index: {}]   ;;  %s2416_s7 = inlined_call_operand.vmem [shape: f32[32,128], index: 7, kind: output, shape index: {}]  }
   0x1   :  { %v66_v0 = vld [vmem:[%s2409_s1 + $0x80] sm:$0xff]  ;;  %v67_v1 = vld [vmem:[%s2409_s1 + $0x88] sm:$0xff]  ;;  %26 = vst [vmem:[#allocation2] sm:$0x1] %v1630_v3  ;;  %27 = vst [vmem:[#allocation2 + $0x18] sm:$0x1] %v1630_v3 }
   0x2   :  { %v50_v2 = vld [vmem:[%s2409_s1] sm:$0xff]  ;;  %28 = vst [vmem:[#allocation2 + $0x11] sm:$0x1] %v1630_v3  ;;  %29 = vst [vmem:[#allocation2 + $0x29] sm:$0x1] %v1630_v3  ;;  %v1482_v4 = vpack.c.bf16 %v67_v1, %v66_v0  ;;  %v51_v5 = vld [vmem:[%s2409_s1 + $0x8] sm:$0xff] }
   0x3   :  { %654 = vst [vmem:[#allocation3] sm:$0x1] %v1630_v3  ;;  %655 = vst [vmem:[#allocation3 + $0x18] sm:$0x1] %v1630_v3  ;;  %v82_v6 = vld [vmem:[%s2409_s1 + $0x100] sm:$0xff]  ;;  %v83_v7 = vld [vmem:[%s2409_s1 + $0x108] sm:$0xff]  ;;  %v1484_v8 = vpack.c.bf16 %v51_v5, %v50_v2 }
   0x4   :  { %656 = vst [vmem:[#allocation3 + $0x11] sm:$0x1] %v1630_v3  ;;  %657 = vst [vmem:[#allocation3 + $0x29] sm:$0x1] %v1630_v3  ;;  %v1514_v9 = vpack.c.bf16 %v83_v7, %v82_v6  ;;  %v68_v10 = vld [vmem:[%s2409_s1 + $0x90] sm:$0xff]  ;;  %v69_v11 = vld [vmem:[%s2409_s1 + $0x98] sm:$0xff]  ;;  %1483 = vmatprep.subr.bf16.mxu0 %v1482_v4 }
   0x5   :  { %v52_v12 = vld [vmem:[%s2409_s1 + $0x10] sm:$0xff]  ;;  %v1486_v13 = vpack.c.bf16 %v69_v11, %v68_v10  ;;  %v53_v14 = vld [vmem:[%s2409_s1 + $0x18] sm:$0xff]  ;;  %1485 = vmatpush3.bf16.msra.mxu0 %v1484_v8  ;;  %v70_v19 = vld [vmem:[%s2409_s1 + $0xa0] sm:$0xff]  ;;  %s1634_s15 = smov 112   ;;  %s1635_s16 = smov 80   ;;  %vm392_vm3 = vcmask 261120  }
   0x6   :  { %v84_v15 = vld [vmem:[%s2409_s1 + $0x110] sm:$0xff]  ;;  %v85_v16 = vld [vmem:[%s2409_s1 + $0x118] sm:$0xff]  ;;  %1515 = vmatprep.subr.bf16.mxu1 %v1514_v9  ;;  %v1488_v17 = vpack.c.bf16 %v53_v14, %v52_v12  ;;  %v71_v20 = vld [vmem:[%s2409_s1 + $0xa8] sm:$0xff]  ;;  %s1636_s17 = smov 88   ;;  %s1637_s18 = smov 64   ;;  %vm394_vm4 = vcmask 326656  }
   0x7   :  { %v1518_v18 = vpack.c.bf16 %v85_v16, %v84_v15  ;;  %v54_v21 = vld [vmem:[%s2409_s1 + $0x20] sm:$0xff]  ;;  %1517 = vmatpush3.bf16.msra.mxu1 %v1514_v9  ;;  %1487 = vmatprep.subr.bf16.mxu0 %v1486_v13  ;;  %v1490_v22 = vpack.c.bf16 %v71_v20, %v70_v19  ;;  %v55_v23 = vld [vmem:[%s2409_s1 + $0x28] sm:$0xff]  ;;  %v72_v27 = vld [vmem:[%s2409_s1 + $0xb0] sm:$0xff]  ;;  %s1638_s19 = smov 72   ;;  %s1639_s20 = smov 48   ;;  %vm396_vm5 = vcmask 392192  }
   0x8   :  { %v86_v24 = vld [vmem:[%s2409_s1 + $0x120] sm:$0xff]  ;;  %v87_v25 = vld [vmem:[%s2409_s1 + $0x128] sm:$0xff]  ;;  %v73_v28 = vld [vmem:[%s2409_s1 + $0xb8] sm:$0xff]  ;;  %v1492_v31 = vpack.c.bf16 %v55_v23, %v54_v21  ;;  %s1640_s21 = smov 56   ;;  %s1641_s22 = smov 32   ;;  %vm398_vm6 = vcmask 457728  }
   0x9   :  { %1519 = vmatprep.subr.bf16.mxu1 %v1518_v18  ;;  %v1522_v26 = vpack.c.bf16 %v87_v25, %v86_v24  ;;  %v88_v29 = vld [vmem:[%s2409_s1 + $0x130] sm:$0xff]  ;;  %v89_v30 = vld [vmem:[%s2409_s1 + $0x138] sm:$0xff]  ;;  %1489 = vmatpush3.bf16.msra.mxu0 %v1488_v17  ;;  %v1494_v32 = vpack.c.bf16 %v73_v28, %v72_v27  ;;  %v74_v36 = vld [vmem:[%s2409_s1 + $0xc0] sm:$0xff]  ;;  %s1642_s23 = smov 40   ;;  %s1643_s24 = smov 16   ;;  %vm400_vm7 = vcmask 523264  }
   0xa   :  { %1491 = vmatprep.subr.bf16.mxu0 %v1490_v22  ;;  %v56_v33 = vld [vmem:[%s2409_s1 + $0x30] sm:$0xff]  ;;  %v57_v34 = vld [vmem:[%s2409_s1 + $0x38] sm:$0xff]  ;;  %v1526_v35 = vpack.c.bf16 %v89_v30, %v88_v29  ;;  %v75_v37 = vld [vmem:[%s2409_s1 + $0xc8] sm:$0xff]  ;;  %s1644_s25 = smov 24   ;;  %s1645_s26 = smov 8   ;;  %vm402_vm8 = vcmask 588800  }
   0xb   :  { %1521 = vmatpush3.bf16.msra.mxu1 %v1518_v18  ;;  %v90_v38 = vld [vmem:[%s2409_s1 + $0x140] sm:$0xff]  ;;  %v91_v39 = vld [vmem:[%s2409_s1 + $0x148] sm:$0xff]  ;;  %v1496_v40 = vpack.c.bf16 %v57_v34, %v56_v33  ;;  %v1498_v41 = vpack.c.bf16 %v75_v37, %v74_v36  ;;  %v76_v45 = vld [vmem:[%s2409_s1 + $0xd0] sm:$0xff]  ;;  %vm404_vm9 = vcmask 654336   ;;  %vm406_vm10 = vcmask 719872  }
   0xc   :  { %1523 = vmatprep.subr.bf16.mxu1 %v1522_v26  ;;  %v58_v42 = vld [vmem:[%s2409_s1 + $0x40] sm:$0xff]  ;;  %v59_v43 = vld [vmem:[%s2409_s1 + $0x48] sm:$0xff]  ;;  %v1530_v44 = vpack.c.bf16 %v91_v39, %v90_v38  ;;  %v77_v46 = vld [vmem:[%s2409_s1 + $0xd8] sm:$0xff]  ;;  %vm408_vm11 = vcmask 785408   ;;  %vm410_vm12 = vcmask 850944   ;;  %vm412_vm13 = vcmask 916480  }
   0xd   :  { %1493 = vmatpush3.bf16.msra.mxu0 %v1492_v31  ;;  %v92_v47 = vld [vmem:[%s2409_s1 + $0x150] sm:$0xff]  ;;  %v93_v48 = vld [vmem:[%s2409_s1 + $0x158] sm:$0xff]  ;;  %v1500_v49 = vpack.c.bf16 %v59_v43, %v58_v42  ;;  %v30_v50 = vld [vmem:[%s2410_s0] sm:$0xff]  ;;  %v1502_v53 = vpack.c.bf16 %v77_v46, %v76_v45  ;;  %vm414_vm14 = vcmask 982016  }
   0xe   :  { %1495 = vmatprep.subr.bf16.mxu0 %v1494_v32  ;;  %v31_v51 = vld [vmem:[%s2410_s0 + $0x8] sm:$0xff]  ;;  %v32_v52 = vld [vmem:[%s2410_s0 + $0x10] sm:$0xff]  ;;  %v61_v55 = vld [vmem:[%s2409_s1 + $0x58] sm:$0xff]  ;;  %34 = vst [vmem:[#allocation2 + $0x1] sm:$0xff] %v30_v50  ;;  %v1534_v57 = vpack.c.bf16 %v93_v48, %v92_v47  ;;  %162 = vmatprep.mubr.f32.mxu0 %v30_v50 }
   0xf   :  { %1525 = vmatpush3.bf16.msra.mxu1 %v1522_v26  ;;  %v60_v54 = vld [vmem:[%s2409_s1 + $0x50] sm:$0xff]  ;;  %35 = vst [vmem:[#allocation2 + $0x9] sm:$0xff] %v31_v51  ;;  %36 = vst [vmem:[#allocation2 + $0x19] sm:$0xff] %v32_v52  ;;  %v33_v56 = vld [vmem:[%s2410_s0 + $0x18] sm:$0xff] }
  0x10   :  { %1527 = vmatprep.subr.bf16.mxu1 %v1526_v35  ;;  %v78_v58 = vld [vmem:[%s2409_s1 + $0xe0] sm:$0xff]  ;;  %v79_v59 = vld [vmem:[%s2409_s1 + $0xe8] sm:$0xff]  ;;  %37 = vst [vmem:[#allocation2 + $0x21] sm:$0xff] %v33_v56  ;;  %v1504_v62 = vpack.c.bf16 %v61_v55, %v60_v54  ;;  %v80_v3 = vld [vmem:[%s2409_s1 + $0xf0] sm:$0xff] }
  0x11   :  { %1497 = vmatpush3.bf16.msra.mxu0 %v1496_v40  ;;  %v94_v60 = vld [vmem:[%s2409_s1 + $0x160] sm:$0xff]  ;;  %v95_v61 = vld [vmem:[%s2409_s1 + $0x168] sm:$0xff]  ;;  %v1506_v63 = vpack.c.bf16 %v79_v59, %v78_v58  ;;  %v81_v4 = vld [vmem:[%s2409_s1 + $0xf8] sm:$0xff] }
  0x12   :  { %1499 = vmatprep.subr.bf16.mxu0 %v1498_v41  ;;  %v62_v0 = vld [vmem:[%s2409_s1 + $0x60] sm:$0xff]  ;;  %v63_v1 = vld [vmem:[%s2409_s1 + $0x68] sm:$0xff]  ;;  %v1538_v2 = vpack.c.bf16 %v95_v61, %v94_v60  ;;  %v96_v5 = vld [vmem:[%s2409_s1 + $0x170] sm:$0xff]  ;;  %v1510_v9 = vpack.c.bf16 %v81_v4, %v80_v3 }
  0x13   :  { %1529 = vmatpush3.bf16.msra.mxu1 %v1526_v35  ;;  %v97_v6 = vld [vmem:[%s2409_s1 + $0x178] sm:$0xff]  ;;  %v1508_v7 = vpack.c.bf16 %v63_v1, %v62_v0  ;;  %v64_v10 = vld [vmem:[%s2409_s1 + $0x70] sm:$0xff] }
  0x14   :  { %1531 = vmatprep.subr.bf16.mxu1 %v1530_v44  ;;  %v65_v11 = vld [vmem:[%s2409_s1 + $0x78] sm:$0xff]  ;;  %v1542_v12 = vpack.c.bf16 %v97_v6, %v96_v5  ;;  %s1631_s1 = smov 104  }
  0x15   :  { %1501 = vmatpush3.bf16.msra.mxu0 %v1500_v49  ;;  %v1512_v13 = vpack.c.bf16 %v65_v11, %v64_v10  ;;  %v38_v14 = vld [vmem:[#allocation2] sm:$0xff] }
  0x16   :  { %1503 = vmatprep.subr.bf16.mxu0 %v1502_v53  ;;  %v46_v8 = vld [vmem:[#allocation2 + $0x2] sm:$0xff]  ;;  %v47_v15 = vld [vmem:[#allocation2 + $0xa] sm:$0xff]  ;;  %v40_v19 = vld [vmem:[#allocation2 + $0x18] sm:$0xff] }
  0x17   :  { %1533 = vmatpush3.bf16.msra.mxu1 %v1530_v44  ;;  %1438 = vmatprep.mubr.f32.mxu1 %v46_v8  ;;  %v48_v16 = vld [vmem:[#allocation2 + $0x1a] sm:$0xff]  ;;  %v39_v17 = vld [vmem:[#allocation2 + $0x8] sm:$0xff] }
  0x18   :  { %1535 = vmatprep.subr.bf16.mxu1 %v1534_v57  ;;  %v49_v18 = vld [vmem:[#allocation2 + $0x22] sm:$0xff] }
  0x19   :  { %1505 = vmatpush3.bf16.msra.mxu0 %v1504_v62  ;;  %v41_v20 = vld [vmem:[#allocation2 + $0x20] sm:$0xff] }
  0x1a   :  { %1507 = vmatprep.subr.bf16.mxu0 %v1506_v63 }
  0x1b   :  { %1537 = vmatpush3.bf16.msra.mxu1 %v1534_v57 }
  0x1c   :  { %1539 = vmatprep.subr.bf16.mxu1 %v1538_v2 }
  0x1d   :  { %1509 = vmatpush3.bf16.msra.mxu0 %v1508_v7 }
  0x1e   :  { %1511 = vmatprep.subr.bf16.mxu0 %v1510_v9 }
  0x1f   :  { %1541 = vmatpush3.bf16.msra.mxu1 %v1538_v2 }
  0x20   :  { %1543 = vmatprep.subr.bf16.mxu1 %v1542_v12 }
  0x21   :  { %1513 = vmatpush3.bf16.msra.mxu0 %v1512_v13 }
  0x23   :  { %1545 = vmatpush3.bf16.msra.mxu1 %v1542_v12 }
  0x24   :  { %163 = vmatmul.mubr.f32.vlgmr.msra.gmra.mrb[0].mxu0 %v38_v14 }
  0x25   :  { %167 = vmatprep.mubr.f32.mxu0 %v31_v51 }
  0x26   :  { %1439 = vmatmul.mubr.f32.vlgmr.msra.gmra.mrb[0].mxu1 %v47_v15 }
  0x27   :  { %1441 = vmatprep.mubr.f32.mxu1 %v48_v16 }
  0x28   :  { %168 = vmatmul.mubr.f32.gmra.mrb[2].mxu0 %v39_v17 }
  0x29   :  { %172 = vmatprep.mubr.f32.mxu0 %v32_v52 }
  0x2a   :  { %1442 = vmatmul.mubr.f32.gmra.mrb[2].mxu1 %v49_v18 }
  0x2c   :  { %173 = vmatmul.mubr.f32.gmra.mrb[4].mxu0 %v40_v19 }
  0x2d   :  { %177 = vmatprep.mubr.f32.mxu0 %v33_v56 }
  0x30   :  { %178 = vmatmul.mubr.f32.gmra.mrb[6].mxu0 %v41_v20 }
  0xf7   :  { %v1310_v21 = vpop.f32.mrb[0].mxu0 }
  0xf8   :  { %v1311_v22 = vpop.f32.mrb[1].mxu0 }
  0xf9   :  { %v1440_v23 = vpop.f32.mrb[0].mxu1  ;;  %v1312_v24 = vadd.f32 %v1311_v22, %v1310_v21 }
  0xfa   :  { %v249_v25 = vpop.f32.mrb[1].mxu1 }
  0xfb   :  { %v1842_v26 = vadd.f32 %v1312_v24, %v249_v25  ;;  %v1313_v27 = vpop.f32.mrb[2].mxu0 }
  0xfc   :  { %v1314_v28 = vpop.f32.mrb[3].mxu0 }
  0xfd   :  { %v1443_v29 = vpop.f32.mrb[2].mxu1  ;;  %v1315_v30 = vadd.f32 %v1314_v28, %v1313_v27 }
  0xfe   :  { %v259_v31 = vpop.f32.mrb[3].mxu1 }
  0xff   :  { %v1844_v32 = vadd.f32 %v1440_v23, %v1315_v30  ;;  %v1316_v33 = vpop.f32.mrb[4].mxu0 }
 0x100   :  { %v1317_v34 = vpop.f32.mrb[5].mxu0 }
 0x101   :  { %v1318_v35 = vadd.f32 %v1317_v34, %v1316_v33  ;;  %v268_v39 = vadd.f32 %v1844_v32, %v1842_v26 }
 0x103   :  { %v1846_v36 = vadd.f32 %v1318_v35, %v259_v31  ;;  %v1319_v37 = vpop.f32.mrb[6].mxu0 }
 0x104   :  { %v1320_v38 = vpop.f32.mrb[7].mxu0 }
 0x105   :  { %v1321_v40 = vadd.f32 %v1320_v38, %v1319_v37  ;;  %v269_v41 = vadd.f32 %v268_v39, %v1846_v36  ;;  %v416_v39 = vlaneseq }
 0x107   :  { %v1851_v42 = vadd.f32 %v1443_v29, %v1321_v40 }
 0x109   :  { %v270_v43 = vadd.f32 %v269_v41, %v1851_v42 }
 0x10b   :  { %v271_v44 = vrot.slane %v270_v43, 4 }
 0x10d   :  { %v272_v45 = vadd.f32 %v271_v44, %v270_v43 }
 0x10f   :  { %v273_v46 = vrot.slane %v272_v45, 2 }
 0x111   :  { %v274_v47 = vadd.f32 %v273_v46, %v272_v45  ;;  %v417_v45 = vshrl.u32 %v416_v39, 7 }
 0x113   :  { %v275_v48 = vrot.slane %v274_v47, 1 }
 0x115   :  { %v276_v49 = vadd.f32 %v275_v48, %v274_v47 }
 0x117   :  { %286 = vrot.lane.b32.xlu1 %v276_v49, %s1631_s1  ;;  %278 = vrot.lane.b32.xlu0 %v276_v49, %s1632_s13 }
 0x11b   :  { %290 = vrot.lane.b32.xlu1 %v276_v49, %s1633_s14  ;;  %282 = vrot.lane.b32.xlu0 %v276_v49, %s1634_s15 }
 0x11f   :  { %298 = vrot.lane.b32.xlu1 %v276_v49, %s1635_s16  ;;  %294 = vrot.lane.b32.xlu0 %v276_v49, %s1636_s17 }
 0x123   :  { %306 = vrot.lane.b32.xlu1 %v276_v49, %s1637_s18  ;;  %302 = vrot.lane.b32.xlu0 %v276_v49, %s1638_s19 }
 0x127   :  { %314 = vrot.lane.b32.xlu1 %v276_v49, %s1639_s20  ;;  %310 = vrot.lane.b32.xlu0 %v276_v49, %s1640_s21 }
 0x12b   :  { %322 = vrot.lane.b32.xlu1 %v276_v49, %s1641_s22  ;;  %318 = vrot.lane.b32.xlu0 %v276_v49, %s1642_s23 }
 0x12f   :  { %330 = vrot.lane.b32.xlu1 %v276_v49, %s1643_s24  ;;  %326 = vrot.lane.b32.xlu0 %v276_v49, %s1644_s25 }
 0x133   :  { %334 = vrot.lane.b32.xlu0 %v276_v49, %s1645_s26 }
 0x189   :  { %v287_v50 = vpop.permute.xlu1 %286  ;;  %v279_v51 = vpop.permute.xlu0 %278 }
 0x18a   :  { %v281_v52 = vadd.f32 %v279_v51, %v276_v49 }
 0x18d   :  { %v291_v53 = vpop.permute.xlu1 %290  ;;  %v283_v54 = vpop.permute.xlu0 %282 }
 0x18e   :  { %v285_v55 = vadd.f32 %v283_v54, %v281_v52 }
 0x190   :  { %v289_v56 = vadd.f32 %v287_v50, %v285_v55  ;;  %v1897_v50 = vsub.s32 0, %v417_v45 }
 0x191   :  { %v299_v57 = vpop.permute.xlu1 %298  ;;  %v295_v58 = vpop.permute.xlu0 %294 }
 0x192   :  { %v293_v59 = vadd.f32 %v291_v53, %v289_v56 }
 0x194   :  { %v297_v60 = vadd.f32 %v295_v58, %v293_v59 }
 0x195   :  { %v307_v61 = vpop.permute.xlu1 %306  ;;  %v303_v62 = vpop.permute.xlu0 %302 }
 0x196   :  { %v301_v63 = vadd.f32 %v299_v57, %v297_v60 }
 0x198   :  { %v305_v0 = vadd.f32 %v303_v62, %v301_v63 }
 0x199   :  { %v315_v1 = vpop.permute.xlu1 %314  ;;  %v311_v2 = vpop.permute.xlu0 %310 }
 0x19a   :  { %v309_v3 = vadd.f32 %v307_v61, %v305_v0 }
 0x19c   :  { %v313_v4 = vadd.f32 %v311_v2, %v309_v3 }
 0x19d   :  { %v319_v5 = vpop.permute.xlu0 %318  ;;  %v323_v7 = vpop.permute.xlu1 %322 }
 0x19e   :  { %v317_v6 = vadd.f32 %v315_v1, %v313_v4  ;;  %v1939_v4 = vld [vmem:[%s2411_s3] sm:$0x1] }
 0x1a0   :  { %v321_v8 = vadd.f32 %v319_v5, %v317_v6  ;;  %v1943_v5 = vrot.slane %v1939_v4, %v1897_v50 }
 0x1a1   :  { %v327_v9 = vpop.permute.xlu0 %326  ;;  %v331_v12 = vpop.permute.xlu1 %330 }
 0x1a2   :  { %v325_v10 = vadd.f32 %v323_v7, %v321_v8 }
 0x1a4   :  { %v329_v11 = vadd.f32 %v327_v9, %v325_v10 }
 0x1a5   :  { %v335_v14 = vpop.permute.xlu0 %334 }
 0x1a6   :  { %v333_v13 = vadd.f32 %v331_v12, %v329_v11 }
 0x1a8   :  { %v337_v15 = vadd.f32 %v335_v14, %v333_v13 }
 0x1aa   :  { %v339_v16 = vmul.f32 0.001953125, %v337_v15 }
 0x1ac   :  { %344 = vrot.lane.b32.xlu0 %v339_v16, %s1643_s24  ;;  %341 = vrot.lane.b32.xlu1 %v339_v16, %s1645_s26 }
 0x1b0   :  { %350 = vrot.lane.b32.xlu0 %v339_v16, %s1641_s22  ;;  %347 = vrot.lane.b32.xlu1 %v339_v16, %s1644_s25 }
 0x1b4   :  { %356 = vrot.lane.b32.xlu0 %v339_v16, %s1639_s20  ;;  %353 = vrot.lane.b32.xlu1 %v339_v16, %s1642_s23 }
 0x1b8   :  { %362 = vrot.lane.b32.xlu0 %v339_v16, %s1637_s18  ;;  %359 = vrot.lane.b32.xlu1 %v339_v16, %s1640_s21 }
 0x1bc   :  { %368 = vrot.lane.b32.xlu0 %v339_v16, %s1635_s16  ;;  %365 = vrot.lane.b32.xlu1 %v339_v16, %s1638_s19 }
 0x1c0   :  { %374 = vrot.lane.b32.xlu0 %v339_v16, %s1633_s14  ;;  %371 = vrot.lane.b32.xlu1 %v339_v16, %s1636_s17 }
 0x1c4   :  { %380 = vrot.lane.b32.xlu0 %v339_v16, %s1634_s15  ;;  %377 = vrot.lane.b32.xlu1 %v339_v16, %s1631_s1 }
 0x1c8   :  { %383 = vrot.lane.b32.xlu1 %v339_v16, %s1632_s13 }
 0x21e   :  { %v345_v17 = vpop.permute.xlu0 %344  ;;  %v342_v18 = vpop.permute.xlu1 %341 }
 0x21f   :  { %v387_v19 = vsel %vm386_vm0, %v339_v16, %v342_v18 }
 0x220   :  { %v389_v21 = vsel %vm388_vm1, %v387_v19, %v345_v17 }
 0x222   :  { %v351_v20 = vpop.permute.xlu0 %350  ;;  %v348_v22 = vpop.permute.xlu1 %347 }
 0x223   :  { %v391_v23 = vsel %vm390_vm2, %v389_v21, %v348_v22 }
 0x224   :  { %v393_v25 = vsel %vm392_vm3, %v391_v23, %v351_v20 }
 0x226   :  { %v357_v24 = vpop.permute.xlu0 %356  ;;  %v354_v27 = vpop.permute.xlu1 %353 }
 0x227   :  { %v395_v28 = vsel %vm394_vm4, %v393_v25, %v354_v27 }
 0x228   :  { %v397_v30 = vsel %vm396_vm5, %v395_v28, %v357_v24 }
 0x22a   :  { %v363_v29 = vpop.permute.xlu0 %362  ;;  %v360_v31 = vpop.permute.xlu1 %359 }
 0x22b   :  { %v399_v33 = vsel %vm398_vm6, %v397_v30, %v360_v31 }
 0x22c   :  { %v401_v35 = vsel %vm400_vm7, %v399_v33, %v363_v29 }
 0x22e   :  { %v369_v34 = vpop.permute.xlu0 %368  ;;  %v366_v37 = vpop.permute.xlu1 %365 }
 0x22f   :  { %v403_v38 = vsel %vm402_vm8, %v401_v35, %v366_v37 }
 0x230   :  { %v405_v41 = vsel %vm404_vm9, %v403_v38, %v369_v34 }
 0x232   :  { %v375_v40 = vpop.permute.xlu0 %374  ;;  %v372_v43 = vpop.permute.xlu1 %371 }
 0x233   :  { %v407_v44 = vsel %vm406_vm10, %v405_v41, %v372_v43  ;;  %v499_v41 = vld [vmem:[%s2412_s2] sm:$0x1] }
 0x234   :  { %v409_v46 = vsel %vm408_vm11, %v407_v44, %v375_v40 }
 0x236   :  { %v378_v47 = vpop.permute.xlu1 %377  ;;  %v381_v48 = vpop.permute.xlu0 %380 }
 0x237   :  { %v411_v49 = vsel %vm410_vm12, %v409_v46, %v378_v47  ;;  %v690_v46 = vld [vmem:[%s2413_s4 + $0x80] sm:$0xff]  ;;  %v691_v47 = vld [vmem:[%s2413_s4 + $0x88] sm:$0xff] }
 0x238   :  { %v413_v51 = vsel %vm412_vm13, %v411_v49, %v381_v48  ;;  %v1546_v48 = vpack.c.bf16 %v691_v47, %v690_v46  ;;  %v706_v49 = vld [vmem:[%s2413_s4 + $0x100] sm:$0xff]  ;;  %v703_v46 = vld [vmem:[%s2413_s4 + $0xe8] sm:$0xff] }
 0x23a   :  { %v384_v52 = vpop.permute.xlu1 %383  ;;  %1547 = vmatprep.subr.bf16.mxu0 %v1546_v48  ;;  %v718_v48 = vld [vmem:[%s2413_s4 + $0x160] sm:$0xff] }
 0x23b   :  { %v415_v53 = vsel %vm414_vm14, %v413_v51, %v384_v52  ;;  %v707_v51 = vld [vmem:[%s2413_s4 + $0x108] sm:$0xff]  ;;  %v674_v52 = vld [vmem:[%s2413_s4] sm:$0xff] }
 0x23c   :  { %v419_v54 = vrot.slane %v415_v53, %v1897_v50  ;;  %v1578_v53 = vpack.c.bf16 %v707_v51, %v706_v49  ;;  %v719_v49 = vld [vmem:[%s2413_s4 + $0x168] sm:$0xff]  ;;  %v686_v51 = vld [vmem:[%s2413_s4 + $0x60] sm:$0xff] }
 0x23e   :  { %v1903_v55 = vsub.f32 %v1842_v26, %v419_v54  ;;  %v1906_v56 = vsub.f32 %v1844_v32, %v419_v54  ;;  %v1909_v57 = vsub.f32 %v1846_v36, %v419_v54  ;;  %v1912_v58 = vsub.f32 %v1851_v42, %v419_v54  ;;  %v675_v54 = vld [vmem:[%s2413_s4 + $0x8] sm:$0xff]  ;;  %1579 = vmatprep.subr.bf16.mxu1 %v1578_v53 }
 0x23f   :  { %1581 = vmatpush3.bf16.msra.mxu1 %v1578_v53  ;;  %v687_v53 = vld [vmem:[%s2413_s4 + $0x68] sm:$0xff] }
 0x240   :  { %v424_v59 = vmul.f32 %v1903_v55, %v1903_v55  ;;  %v425_v60 = vmul.f32 %v1906_v56, %v1906_v56  ;;  %v426_v61 = vmul.f32 %v1909_v57, %v1909_v57  ;;  %v427_v32 = vmul.f32 %v1912_v58, %v1912_v58 }
 0x242   :  { %v428_v26 = vadd.f32 %v425_v60, %v424_v59  ;;  %v1548_v59 = vpack.c.bf16 %v675_v54, %v674_v52  ;;  %v692_v60 = vld [vmem:[%s2413_s4 + $0x90] sm:$0xff]  ;;  %v1602_v52 = vpack.c.bf16 %v719_v49, %v718_v48  ;;  %v1572_v54 = vpack.c.bf16 %v687_v53, %v686_v51 }
 0x244   :  { %v429_v62 = vadd.f32 %v428_v26, %v426_v61  ;;  %v693_v61 = vld [vmem:[%s2413_s4 + $0x98] sm:$0xff]  ;;  %1549 = vmatpush3.bf16.msra.mxu0 %v1548_v59  ;;  %v704_v59 = vld [vmem:[%s2413_s4 + $0xf0] sm:$0xff] }
 0x245   :  { %v1550_v26 = vpack.c.bf16 %v693_v61, %v692_v60  ;;  %v705_v60 = vld [vmem:[%s2413_s4 + $0xf8] sm:$0xff]  ;;  %v720_v61 = vld [vmem:[%s2413_s4 + $0x170] sm:$0xff] }
 0x246   :  { %v430_v63 = vadd.f32 %v429_v62, %v427_v32  ;;  %v708_v32 = vld [vmem:[%s2413_s4 + $0x110] sm:$0xff]  ;;  %v709_v62 = vld [vmem:[%s2413_s4 + $0x118] sm:$0xff] }
 0x247   :  { %1551 = vmatprep.subr.bf16.mxu0 %v1550_v26  ;;  %v1574_v26 = vpack.c.bf16 %v705_v60, %v704_v59 }
 0x248   :  { %v431_v36 = vrot.slane %v430_v63, 4 }
 0x24a   :  { %v432_v0 = vadd.f32 %v431_v36, %v430_v63  ;;  %v676_v63 = vld [vmem:[%s2413_s4 + $0x10] sm:$0xff]  ;;  %v1582_v36 = vpack.c.bf16 %v709_v62, %v708_v32  ;;  %v721_v32 = vld [vmem:[%s2413_s4 + $0x178] sm:$0xff] }
 0x24b   :  { %v688_v62 = vld [vmem:[%s2413_s4 + $0x70] sm:$0xff] }
 0x24c   :  { %v433_v1 = vrot.slane %v432_v0, 2  ;;  %1583 = vmatprep.subr.bf16.mxu1 %v1582_v36 }
 0x24d   :  { %1585 = vmatpush3.bf16.msra.mxu1 %v1582_v36  ;;  %v1606_v36 = vpack.c.bf16 %v721_v32, %v720_v61 }
 0x24e   :  { %v434_v42 = vadd.f32 %v433_v1, %v432_v0  ;;  %v677_v0 = vld [vmem:[%s2413_s4 + $0x18] sm:$0xff] }
 0x24f   :  { %v1552_v1 = vpack.c.bf16 %v677_v0, %v676_v63  ;;  %v689_v63 = vld [vmem:[%s2413_s4 + $0x78] sm:$0xff] }
 0x250   :  { %v435_v2 = vrot.slane %v434_v42, 1  ;;  %v1576_v0 = vpack.c.bf16 %v689_v63, %v688_v62 }
 0x251   :  { %1553 = vmatpush3.bf16.msra.mxu0 %v1552_v1 }
 0x252   :  { %v436_v3 = vadd.f32 %v435_v2, %v434_v42  ;;  %v694_v42 = vld [vmem:[%s2413_s4 + $0xa0] sm:$0xff]  ;;  %v695_v2 = vld [vmem:[%s2413_s4 + $0xa8] sm:$0xff] }
 0x254   :  { %442 = vrot.lane.b32.xlu1 %v436_v3, %s1634_s15  ;;  %438 = vrot.lane.b32.xlu0 %v436_v3, %s1632_s13 }
 0x258   :  { %450 = vrot.lane.b32.xlu1 %v436_v3, %s1633_s14  ;;  %446 = vrot.lane.b32.xlu0 %v436_v3, %s1631_s1 }
 0x25c   :  { %458 = vrot.lane.b32.xlu1 %v436_v3, %s1635_s16  ;;  %454 = vrot.lane.b32.xlu0 %v436_v3, %s1636_s17 }
 0x260   :  { %466 = vrot.lane.b32.xlu1 %v436_v3, %s1637_s18  ;;  %462 = vrot.lane.b32.xlu0 %v436_v3, %s1638_s19 }
 0x264   :  { %474 = vrot.lane.b32.xlu1 %v436_v3, %s1639_s20  ;;  %470 = vrot.lane.b32.xlu0 %v436_v3, %s1640_s21 }
 0x268   :  { %482 = vrot.lane.b32.xlu1 %v436_v3, %s1641_s22  ;;  %478 = vrot.lane.b32.xlu0 %v436_v3, %s1642_s23 }
 0x26c   :  { %490 = vrot.lane.b32.xlu1 %v436_v3, %s1643_s24  ;;  %486 = vrot.lane.b32.xlu0 %v436_v3, %s1644_s25 }
 0x270   :  { %494 = vrot.lane.b32.xlu0 %v436_v3, %s1645_s26 }
 0x274   :  { %582 = vrot.lane.b32.xlu0 %v1943_v5, %s1645_s26 }
 0x278   :  { %585 = vrot.lane.b32.xlu0 %v1943_v5, %s1643_s24 }
 0x27c   :  { %588 = vrot.lane.b32.xlu0 %v1943_v5, %s1644_s25 }
 0x280   :  { %591 = vrot.lane.b32.xlu0 %v1943_v5, %s1641_s22 }
 0x284   :  { %594 = vrot.lane.b32.xlu0 %v1943_v5, %s1642_s23 }
 0x288   :  { %597 = vrot.lane.b32.xlu0 %v1943_v5, %s1639_s20 }
 0x28c   :  { %600 = vrot.lane.b32.xlu0 %v1943_v5, %s1640_s21 }
 0x290   :  { %603 = vrot.lane.b32.xlu0 %v1943_v5, %s1637_s18 }
 0x294   :  { %606 = vrot.lane.b32.xlu0 %v1943_v5, %s1638_s19 }
 0x298   :  { %609 = vrot.lane.b32.xlu0 %v1943_v5, %s1635_s16 }
 0x2c6   :  { %v443_v6 = vpop.permute.xlu1 %442  ;;  %v439_v7 = vpop.permute.xlu0 %438 }
 0x2c7   :  { %v441_v8 = vadd.f32 %v439_v7, %v436_v3  ;;  %v1554_v3 = vpack.c.bf16 %v695_v2, %v694_v42  ;;  %v711_v7 = vld [vmem:[%s2413_s4 + $0x128] sm:$0xff] }
 0x2c9   :  { %v445_v9 = vadd.f32 %v443_v6, %v441_v8  ;;  %v710_v6 = vld [vmem:[%s2413_s4 + $0x120] sm:$0xff]  ;;  %1555 = vmatprep.subr.bf16.mxu0 %v1554_v3 }
 0x2ca   :  { %v451_v10 = vpop.permute.xlu1 %450  ;;  %v447_v11 = vpop.permute.xlu0 %446  ;;  %v678_v8 = vld [vmem:[%s2413_s4 + $0x20] sm:$0xff] }
 0x2cb   :  { %v449_v12 = vadd.f32 %v447_v11, %v445_v9  ;;  %v1586_v9 = vpack.c.bf16 %v711_v7, %v710_v6 }
 0x2cd   :  { %v453_v13 = vadd.f32 %v451_v10, %v449_v12  ;;  %v679_v10 = vld [vmem:[%s2413_s4 + $0x28] sm:$0xff]  ;;  %1587 = vmatprep.subr.bf16.mxu1 %v1586_v9  ;;  %v696_v12 = vld [vmem:[%s2413_s4 + $0xb0] sm:$0xff] }
 0x2ce   :  { %v459_v14 = vpop.permute.xlu1 %458  ;;  %v455_v15 = vpop.permute.xlu0 %454  ;;  %v1556_v11 = vpack.c.bf16 %v679_v10, %v678_v8  ;;  %1589 = vmatpush3.bf16.msra.mxu1 %v1586_v9 }
 0x2cf   :  { %v457_v16 = vadd.f32 %v455_v15, %v453_v13  ;;  %v697_v13 = vld [vmem:[%s2413_s4 + $0xb8] sm:$0xff]  ;;  %v712_v15 = vld [vmem:[%s2413_s4 + $0x130] sm:$0xff] }
 0x2d0   :  { %1557 = vmatpush3.bf16.msra.mxu0 %v1556_v11 }
 0x2d1   :  { %v461_v17 = vadd.f32 %v459_v14, %v457_v16  ;;  %v1558_v14 = vpack.c.bf16 %v697_v13, %v696_v12  ;;  %v713_v16 = vld [vmem:[%s2413_s4 + $0x138] sm:$0xff] }
 0x2d2   :  { %v467_v18 = vpop.permute.xlu1 %466  ;;  %v463_v19 = vpop.permute.xlu0 %462 }
 0x2d3   :  { %v465_v20 = vadd.f32 %v463_v19, %v461_v17  ;;  %v680_v17 = vld [vmem:[%s2413_s4 + $0x30] sm:$0xff]  ;;  %v681_v19 = vld [vmem:[%s2413_s4 + $0x38] sm:$0xff]  ;;  %1559 = vmatprep.subr.bf16.mxu0 %v1558_v14 }
 0x2d5   :  { %v469_v21 = vadd.f32 %v467_v18, %v465_v20  ;;  %v1590_v18 = vpack.c.bf16 %v713_v16, %v712_v15  ;;  %v1560_v20 = vpack.c.bf16 %v681_v19, %v680_v17 }
 0x2d6   :  { %v475_v22 = vpop.permute.xlu1 %474  ;;  %v471_v23 = vpop.permute.xlu0 %470 }
 0x2d7   :  { %v473_v24 = vadd.f32 %v471_v23, %v469_v21  ;;  %1591 = vmatprep.subr.bf16.mxu1 %v1590_v18  ;;  %v698_v21 = vld [vmem:[%s2413_s4 + $0xc0] sm:$0xff]  ;;  %1561 = vmatpush3.bf16.msra.mxu0 %v1560_v20 }
 0x2d8   :  { %1593 = vmatpush3.bf16.msra.mxu1 %v1590_v18 }
 0x2d9   :  { %v477_v25 = vadd.f32 %v475_v22, %v473_v24  ;;  %v699_v22 = vld [vmem:[%s2413_s4 + $0xc8] sm:$0xff]  ;;  %v714_v24 = vld [vmem:[%s2413_s4 + $0x140] sm:$0xff] }
 0x2da   :  { %v483_v27 = vpop.permute.xlu1 %482  ;;  %v479_v28 = vpop.permute.xlu0 %478  ;;  %v1562_v23 = vpack.c.bf16 %v699_v22, %v698_v21 }
 0x2db   :  { %v481_v29 = vadd.f32 %v479_v28, %v477_v25  ;;  %v715_v25 = vld [vmem:[%s2413_s4 + $0x148] sm:$0xff] }
 0x2dc   :  { %v1594_v28 = vpack.c.bf16 %v715_v25, %v714_v24  ;;  %1563 = vmatprep.subr.bf16.mxu0 %v1562_v23 }
 0x2dd   :  { %v485_v30 = vadd.f32 %v483_v27, %v481_v29  ;;  %v682_v27 = vld [vmem:[%s2413_s4 + $0x40] sm:$0xff]  ;;  %v683_v29 = vld [vmem:[%s2413_s4 + $0x48] sm:$0xff] }
 0x2de   :  { %v487_v31 = vpop.permute.xlu0 %486  ;;  %v491_v34 = vpop.permute.xlu1 %490  ;;  %1595 = vmatprep.subr.bf16.mxu1 %v1594_v28 }
 0x2df   :  { %v489_v33 = vadd.f32 %v487_v31, %v485_v30  ;;  %v1564_v30 = vpack.c.bf16 %v683_v29, %v682_v27  ;;  %v700_v31 = vld [vmem:[%s2413_s4 + $0xd0] sm:$0xff]  ;;  %1597 = vmatpush3.bf16.msra.mxu1 %v1594_v28 }
 0x2e1   :  { %v493_v35 = vadd.f32 %v491_v34, %v489_v33  ;;  %v701_v33 = vld [vmem:[%s2413_s4 + $0xd8] sm:$0xff]  ;;  %1565 = vmatpush3.bf16.msra.mxu0 %v1564_v30 }
 0x2e2   :  { %v495_v37 = vpop.permute.xlu0 %494  ;;  %v1566_v34 = vpack.c.bf16 %v701_v33, %v700_v31 }
 0x2e3   :  { %v497_v38 = vadd.f32 %v495_v37, %v493_v35  ;;  %v716_v35 = vld [vmem:[%s2413_s4 + $0x150] sm:$0xff]  ;;  %v717_v37 = vld [vmem:[%s2413_s4 + $0x158] sm:$0xff] }
 0x2e4   :  { %1567 = vmatprep.subr.bf16.mxu0 %v1566_v34 }
 0x2e5   :  { %v498_v39 = vmul.f32 0.001953125, %v497_v38  ;;  %v684_v38 = vld [vmem:[%s2413_s4 + $0x50] sm:$0xff] }
 0x2e7   :  { %v500_v40 = vadd.f32 1e-05, %v498_v39  ;;  %v1598_v39 = vpack.c.bf16 %v717_v37, %v716_v35 }
 0x2e9   :  { %1626 = vrsqrt.f32 %v500_v40  ;;  %v685_v40 = vld [vmem:[%s2413_s4 + $0x58] sm:$0xff]  ;;  %1599 = vmatprep.subr.bf16.mxu1 %v1598_v39 }
 0x2ea   :  { %1601 = vmatpush3.bf16.msra.mxu1 %v1598_v39 }
 0x2eb   :  { %1603 = vmatprep.subr.bf16.mxu1 %v1602_v52 }
 0x2ee   :  { %1605 = vmatpush3.bf16.msra.mxu1 %v1602_v52 }
 0x2ef   :  { %1607 = vmatprep.subr.bf16.mxu1 %v1606_v36 }
 0x2f2   :  { %1609 = vmatpush3.bf16.msra.mxu1 %v1606_v36 }
 0x2f3   :  { %v1627_v43 = vpop.eup %1626 }
 0x2f4   :  { %v1969_v44 = vmul.f32 %v1627_v43, %v499_v41  ;;  %v1568_v41 = vpack.c.bf16 %v685_v40, %v684_v38  ;;  %v702_v43 = vld [vmem:[%s2413_s4 + $0xe0] sm:$0xff] }
 0x2f5   :  { %v1570_v47 = vpack.c.bf16 %v703_v46, %v702_v43 }
 0x2f6   :  { %v1973_v45 = vrot.slane %v1969_v44, %v1897_v50  ;;  %1569 = vmatpush3.bf16.msra.mxu0 %v1568_v41 }
 0x2f7   :  { %1571 = vmatprep.subr.bf16.mxu0 %v1570_v47 }
 0x2f8   :  { %511 = vrot.lane.b32.xlu0 %v1973_v45, %s1643_s24  ;;  %508 = vrot.lane.b32.xlu1 %v1973_v45, %s1645_s26 }
 0x2fa   :  { %1573 = vmatpush3.bf16.msra.mxu0 %v1572_v54 }
 0x2fb   :  { %1575 = vmatprep.subr.bf16.mxu0 %v1574_v26 }
 0x2fc   :  { %514 = vrot.lane.b32.xlu1 %v1973_v45, %s1644_s25  ;;  %612 = vrot.lane.b32.xlu0 %v1943_v5, %s1636_s17 }
 0x2fe   :  { %1577 = vmatpush3.bf16.msra.mxu0 %v1576_v0 }
 0x300   :  { %517 = vrot.lane.b32.xlu1 %v1973_v45, %s1641_s22  ;;  %615 = vrot.lane.b32.xlu0 %v1943_v5, %s1633_s14 }
 0x304   :  { %520 = vrot.lane.b32.xlu1 %v1973_v45, %s1642_s23  ;;  %618 = vrot.lane.b32.xlu0 %v1943_v5, %s1631_s1 }
 0x308   :  { %523 = vrot.lane.b32.xlu1 %v1973_v45, %s1639_s20  ;;  %624 = vrot.lane.b32.xlu0 %v1943_v5, %s1632_s13 }
 0x30c   :  { %526 = vrot.lane.b32.xlu1 %v1973_v45, %s1640_s21 }
 0x310   :  { %529 = vrot.lane.b32.xlu1 %v1973_v45, %s1637_s18 }
 0x314   :  { %532 = vrot.lane.b32.xlu1 %v1973_v45, %s1638_s19 }
 0x318   :  { %535 = vrot.lane.b32.xlu1 %v1973_v45, %s1635_s16 }
 0x31c   :  { %538 = vrot.lane.b32.xlu1 %v1973_v45, %s1636_s17 }
 0x320   :  { %541 = vrot.lane.b32.xlu1 %v1973_v45, %s1633_s14 }
 0x324   :  { %544 = vrot.lane.b32.xlu1 %v1973_v45, %s1631_s1 }
 0x328   :  { %547 = vrot.lane.b32.xlu1 %v1973_v45, %s1634_s15 }
 0x32c   :  { %550 = vrot.lane.b32.xlu1 %v1973_v45, %s1632_s13  ;;  %v583_v45 = vpop.permute.xlu0 %582 }
 0x32d   :  { %v627_v14 = vsel %vm386_vm0, %v1939_v4, %v583_v45 }
 0x330   :  { %621 = vrot.lane.b32.xlu1 %v1943_v5, %s1634_s15  ;;  %v586_v1 = vpop.permute.xlu0 %585 }
 0x331   :  { %v628_v16 = vsel %vm388_vm1, %v627_v14, %v586_v1 }
 0x334   :  { %v589_v42 = vpop.permute.xlu0 %588 }
 0x335   :  { %v629_v18 = vsel %vm390_vm2, %v628_v16, %v589_v42 }
 0x338   :  { %v592_v2 = vpop.permute.xlu0 %591 }
 0x339   :  { %v630_v21 = vsel %vm392_vm3, %v629_v18, %v592_v2 }
 0x33c   :  { %v595_v3 = vpop.permute.xlu0 %594 }
 0x33d   :  { %v631_v22 = vsel %vm394_vm4, %v630_v21, %v595_v3 }
 0x340   :  { %v598_v7 = vpop.permute.xlu0 %597 }
 0x341   :  { %v632_v25 = vsel %vm396_vm5, %v631_v22, %v598_v7 }
 0x344   :  { %v601_v10 = vpop.permute.xlu0 %600 }
 0x345   :  { %v633_v28 = vsel %vm398_vm6, %v632_v25, %v601_v10 }
 0x348   :  { %v604_v12 = vpop.permute.xlu0 %603 }
 0x349   :  { %v634_v33 = vsel %vm400_vm7, %v633_v28, %v604_v12 }
 0x34c   :  { %v607_v5 = vpop.permute.xlu0 %606 }
 0x34d   :  { %v635_v38 = vsel %vm402_vm8, %v634_v33, %v607_v5 }
 0x350   :  { %v610_v19 = vpop.permute.xlu0 %609 }
 0x351   :  { %v636_v46 = vsel %vm404_vm9, %v635_v38, %v610_v19 }
 0x36a   :  { %v509_v6 = vpop.permute.xlu1 %508  ;;  %v512_v24 = vpop.permute.xlu0 %511 }
 0x36b   :  { %v553_v4 = vsel %vm386_vm0, %v1969_v44, %v509_v6 }
 0x36c   :  { %v554_v30 = vsel %vm388_vm1, %v553_v4, %v512_v24 }
 0x36e   :  { %v515_v8 = vpop.permute.xlu1 %514  ;;  %v613_v29 = vpop.permute.xlu0 %612 }
 0x36f   :  { %v555_v34 = vsel %vm390_vm2, %v554_v30, %v515_v8  ;;  %v637_v52 = vsel %vm406_vm10, %v636_v46, %v613_v29 }
 0x372   :  { %v518_v9 = vpop.permute.xlu1 %517  ;;  %v616_v44 = vpop.permute.xlu0 %615 }
 0x373   :  { %v556_v35 = vsel %vm392_vm3, %v555_v34, %v518_v9  ;;  %v638_v26 = vsel %vm408_vm11, %v637_v52, %v616_v44 }
 0x376   :  { %v521_v11 = vpop.permute.xlu1 %520  ;;  %v619_v54 = vpop.permute.xlu0 %618 }
 0x377   :  { %v557_v37 = vsel %vm394_vm4, %v556_v35, %v521_v11  ;;  %v639_v36 = vsel %vm410_vm12, %v638_v26, %v619_v54 }
 0x37a   :  { %v524_v13 = vpop.permute.xlu1 %523  ;;  %v625_v63 = vpop.permute.xlu0 %624 }
 0x37b   :  { %v558_v39 = vsel %vm396_vm5, %v557_v37, %v524_v13 }
 0x37e   :  { %v527_v15 = vpop.permute.xlu1 %526 }
 0x37f   :  { %v559_v41 = vsel %vm398_vm6, %v558_v39, %v527_v15 }
 0x382   :  { %v530_v17 = vpop.permute.xlu1 %529 }
 0x383   :  { %v560_v43 = vsel %vm400_vm7, %v559_v41, %v530_v17 }
 0x386   :  { %v533_v20 = vpop.permute.xlu1 %532 }
 0x387   :  { %v561_v47 = vsel %vm402_vm8, %v560_v43, %v533_v20 }
 0x38a   :  { %v536_v23 = vpop.permute.xlu1 %535 }
 0x38b   :  { %v562_v48 = vsel %vm404_vm9, %v561_v47, %v536_v23 }
 0x38e   :  { %v539_v27 = vpop.permute.xlu1 %538 }
 0x38f   :  { %v563_v51 = vsel %vm406_vm10, %v562_v48, %v539_v27 }
 0x392   :  { %v542_v31 = vpop.permute.xlu1 %541 }
 0x393   :  { %v564_v53 = vsel %vm408_vm11, %v563_v51, %v542_v31 }
 0x396   :  { %v545_v40 = vpop.permute.xlu1 %544 }
 0x397   :  { %v565_v59 = vsel %vm410_vm12, %v564_v53, %v545_v40 }
 0x39a   :  { %v548_v49 = vpop.permute.xlu1 %547 }
 0x39b   :  { %v566_v60 = vsel %vm412_vm13, %v565_v59, %v548_v49 }
 0x39e   :  { %v551_v61 = vpop.permute.xlu1 %550 }
 0x39f   :  { %v567_v32 = vsel %vm414_vm14, %v566_v60, %v551_v61 }
 0x3a0   :  { %v571_v62 = vrot.slane %v567_v32, %v1897_v50 }
 0x3a2   :  { %v622_v0 = vpop.permute.xlu1 %621  ;;  %v572_v1 = vmul.f32 %v571_v62, %v1903_v55  ;;  %v573_v2 = vmul.f32 %v571_v62, %v1906_v56  ;;  %v574_v3 = vmul.f32 %v571_v62, %v1909_v57  ;;  %v575_v6 = vmul.f32 %v571_v62, %v1912_v58 }
 0x3a3   :  { %v640_v45 = vsel %vm412_vm13, %v639_v36, %v622_v0 }
 0x3a4   :  { %v641_v42 = vsel %vm414_vm14, %v640_v45, %v625_v63 }
 0x3a5   :  { %v645_v7 = vrot.slane %v641_v42, %v1897_v50 }
 0x3a7   :  { %v646_v8 = vadd.f32 %v645_v7, %v572_v1  ;;  %v647_v9 = vadd.f32 %v645_v7, %v573_v2  ;;  %v648_v10 = vadd.f32 %v645_v7, %v574_v3  ;;  %v649_v11 = vadd.f32 %v645_v7, %v575_v6 }
 0x3a9   :  { %v650_v12 = vmax.f32 %v646_v8, 0.0  ;;  %v651_v13 = vmax.f32 %v647_v9, 0.0  ;;  %v652_v14 = vmax.f32 %v648_v10, 0.0  ;;  %v653_v15 = vmax.f32 %v649_v11, 0.0 }
 0x3ab   :  { %658 = vst [vmem:[#allocation3 + $0x1] sm:$0xff] %v650_v12  ;;  %659 = vst [vmem:[#allocation3 + $0x9] sm:$0xff] %v651_v13  ;;  %786 = vmatprep.mubr.f32.mxu0 %v650_v12 }
 0x3ac   :  { %660 = vst [vmem:[#allocation3 + $0x19] sm:$0xff] %v652_v14  ;;  %661 = vst [vmem:[#allocation3 + $0x21] sm:$0xff] %v653_v15 }
 0x3b2   :  { %v670_v55 = vld [vmem:[#allocation3 + $0x2] sm:$0xff]  ;;  %v671_v57 = vld [vmem:[#allocation3 + $0xa] sm:$0xff] }
 0x3b3   :  { %v662_v56 = vld [vmem:[#allocation3] sm:$0xff]  ;;  %1476 = vmatprep.mubr.f32.mxu1 %v670_v55  ;;  %v663_v5 = vld [vmem:[#allocation3 + $0x8] sm:$0xff]  ;;  %v664_v17 = vld [vmem:[#allocation3 + $0x18] sm:$0xff] }
 0x3b4   :  { %787 = vmatmul.mubr.f32.vlgmr.msra.gmra.mrb[8].mxu0 %v662_v56  ;;  %1477 = vmatmul.mubr.f32.vlgmr.msra.gmra.mrb[4].mxu1 %v671_v57  ;;  %v672_v58 = vld [vmem:[#allocation3 + $0x1a] sm:$0xff]  ;;  %v673_v16 = vld [vmem:[#allocation3 + $0x22] sm:$0xff] }
 0x3b5   :  { %791 = vmatprep.mubr.f32.mxu0 %v651_v13  ;;  %1479 = vmatprep.mubr.f32.mxu1 %v672_v58  ;;  %v665_v18 = vld [vmem:[#allocation3 + $0x20] sm:$0xff] }
 0x3b8   :  { %792 = vmatmul.mubr.f32.gmra.mrb[10].mxu0 %v663_v5  ;;  %1480 = vmatmul.mubr.f32.gmra.mrb[6].mxu1 %v673_v16 }
 0x3b9   :  { %796 = vmatprep.mubr.f32.mxu0 %v652_v14 }
 0x3bc   :  { %797 = vmatmul.mubr.f32.gmra.mrb[12].mxu0 %v664_v17 }
 0x3bd   :  { %801 = vmatprep.mubr.f32.mxu0 %v653_v15 }
 0x3c0   :  { %802 = vmatmul.mubr.f32.gmra.mrb[14].mxu0 %v665_v18 }
 0x487   :  { %v1374_v19 = vpop.f32.mrb[8].mxu0  ;;  %v1478_v20 = vpop.f32.mrb[4].mxu1 }
 0x488   :  { %v1375_v21 = vpop.f32.mrb[9].mxu0  ;;  %v873_v23 = vpop.f32.mrb[5].mxu1 }
 0x489   :  { %v1376_v22 = vadd.f32 %v1375_v21, %v1374_v19 }
 0x48b   :  { %v2197_v24 = vadd.f32 %v1376_v22, %v873_v23  ;;  %v1377_v25 = vpop.f32.mrb[10].mxu0  ;;  %v1481_v27 = vpop.f32.mrb[6].mxu1 }
 0x48c   :  { %v1378_v4 = vpop.f32.mrb[11].mxu0  ;;  %v883_v29 = vpop.f32.mrb[7].mxu1 }
 0x48d   :  { %v1379_v28 = vadd.f32 %v1378_v4, %v1377_v25 }
 0x48f   :  { %v2199_v30 = vadd.f32 %v1478_v20, %v1379_v28  ;;  %v1380_v31 = vpop.f32.mrb[12].mxu0 }
 0x490   :  { %v1381_v33 = vpop.f32.mrb[13].mxu0 }
 0x491   :  { %v1382_v34 = vadd.f32 %v1381_v33, %v1380_v31  ;;  %v896_v39 = vadd.f32 %v2199_v30, %v2197_v24 }
 0x493   :  { %v2201_v35 = vadd.f32 %v1382_v34, %v883_v29  ;;  %v1383_v37 = vpop.f32.mrb[14].mxu0 }
 0x494   :  { %v1384_v38 = vpop.f32.mrb[15].mxu0 }
 0x495   :  { %v1385_v40 = vadd.f32 %v1384_v38, %v1383_v37  ;;  %v897_v44 = vadd.f32 %v896_v39, %v2201_v35 }
 0x497   :  { %v2206_v41 = vadd.f32 %v1481_v27, %v1385_v40 }
 0x499   :  { %v898_v43 = vadd.f32 %v897_v44, %v2206_v41 }
 0x49b   :  { %v899_v46 = vrot.slane %v898_v43, 4 }
 0x49d   :  { %v900_v47 = vadd.f32 %v899_v46, %v898_v43 }
 0x49f   :  { %v901_v48 = vrot.slane %v900_v47, 2 }
 0x4a1   :  { %v902_v49 = vadd.f32 %v901_v48, %v900_v47 }
 0x4a3   :  { %v903_v51 = vrot.slane %v902_v49, 1 }
 0x4a5   :  { %v904_v52 = vadd.f32 %v903_v51, %v902_v49 }
 0x4a7   :  { %910 = vrot.lane.b32.xlu0 %v904_v52, %s1634_s15  ;;  %906 = vrot.lane.b32.xlu1 %v904_v52, %s1632_s13 }
 0x4ab   :  { %918 = vrot.lane.b32.xlu0 %v904_v52, %s1633_s14  ;;  %914 = vrot.lane.b32.xlu1 %v904_v52, %s1631_s1 }
 0x4af   :  { %926 = vrot.lane.b32.xlu0 %v904_v52, %s1635_s16  ;;  %922 = vrot.lane.b32.xlu1 %v904_v52, %s1636_s17 }
 0x4b3   :  { %934 = vrot.lane.b32.xlu0 %v904_v52, %s1637_s18  ;;  %930 = vrot.lane.b32.xlu1 %v904_v52, %s1638_s19 }
 0x4b7   :  { %942 = vrot.lane.b32.xlu0 %v904_v52, %s1639_s20  ;;  %938 = vrot.lane.b32.xlu1 %v904_v52, %s1640_s21 }
 0x4bb   :  { %950 = vrot.lane.b32.xlu0 %v904_v52, %s1641_s22  ;;  %946 = vrot.lane.b32.xlu1 %v904_v52, %s1642_s23 }
 0x4bf   :  { %958 = vrot.lane.b32.xlu0 %v904_v52, %s1643_s24  ;;  %954 = vrot.lane.b32.xlu1 %v904_v52, %s1644_s25 }
 0x4c3   :  { %962 = vrot.lane.b32.xlu1 %v904_v52, %s1645_s26 }
 0x519   :  { %v911_v53 = vpop.permute.xlu0 %910  ;;  %v907_v54 = vpop.permute.xlu1 %906 }
 0x51a   :  { %v909_v59 = vadd.f32 %v907_v54, %v904_v52 }
 0x51c   :  { %v913_v60 = vadd.f32 %v911_v53, %v909_v59 }
 0x51d   :  { %v919_v61 = vpop.permute.xlu0 %918  ;;  %v915_v26 = vpop.permute.xlu1 %914 }
 0x51e   :  { %v917_v32 = vadd.f32 %v915_v26, %v913_v60 }
 0x520   :  { %v921_v62 = vadd.f32 %v919_v61, %v917_v32 }
 0x521   :  { %v927_v63 = vpop.permute.xlu0 %926  ;;  %v923_v36 = vpop.permute.xlu1 %922 }
 0x522   :  { %v925_v0 = vadd.f32 %v923_v36, %v921_v62 }
 0x524   :  { %v929_v45 = vadd.f32 %v927_v63, %v925_v0 }
 0x525   :  { %v935_v1 = vpop.permute.xlu0 %934  ;;  %v931_v42 = vpop.permute.xlu1 %930 }
 0x526   :  { %v933_v2 = vadd.f32 %v931_v42, %v929_v45 }
 0x528   :  { %v937_v3 = vadd.f32 %v935_v1, %v933_v2 }
 0x529   :  { %v943_v6 = vpop.permute.xlu0 %942  ;;  %v939_v7 = vpop.permute.xlu1 %938 }
 0x52a   :  { %v941_v8 = vadd.f32 %v939_v7, %v937_v3 }
 0x52c   :  { %v945_v9 = vadd.f32 %v943_v6, %v941_v8  ;;  %v2292_v6 = vld [vmem:[%s2414_s6] sm:$0x1] }
 0x52d   :  { %v951_v10 = vpop.permute.xlu0 %950  ;;  %v947_v11 = vpop.permute.xlu1 %946  ;;  %v2296_v7 = vrot.slane %v2292_v6, %v1897_v50 }
 0x52e   :  { %v949_v12 = vadd.f32 %v947_v11, %v945_v9 }
 0x530   :  { %v953_v13 = vadd.f32 %v951_v10, %v949_v12 }
 0x531   :  { %v955_v14 = vpop.permute.xlu1 %954  ;;  %v959_v55 = vpop.permute.xlu0 %958 }
 0x532   :  { %v957_v15 = vadd.f32 %v955_v14, %v953_v13 }
 0x534   :  { %v961_v56 = vadd.f32 %v959_v55, %v957_v15 }
 0x535   :  { %v963_v57 = vpop.permute.xlu1 %962 }
 0x536   :  { %v965_v58 = vadd.f32 %v963_v57, %v961_v56 }
 0x538   :  { %v966_v5 = vmul.f32 0.001953125, %v965_v58 }
 0x53a   :  { %971 = vrot.lane.b32.xlu1 %v966_v5, %s1643_s24  ;;  %968 = vrot.lane.b32.xlu0 %v966_v5, %s1645_s26 }
 0x53e   :  { %977 = vrot.lane.b32.xlu1 %v966_v5, %s1641_s22  ;;  %974 = vrot.lane.b32.xlu0 %v966_v5, %s1644_s25 }
 0x542   :  { %983 = vrot.lane.b32.xlu1 %v966_v5, %s1639_s20  ;;  %980 = vrot.lane.b32.xlu0 %v966_v5, %s1642_s23 }
 0x546   :  { %989 = vrot.lane.b32.xlu1 %v966_v5, %s1637_s18  ;;  %986 = vrot.lane.b32.xlu0 %v966_v5, %s1640_s21 }
 0x54a   :  { %995 = vrot.lane.b32.xlu1 %v966_v5, %s1635_s16  ;;  %992 = vrot.lane.b32.xlu0 %v966_v5, %s1638_s19 }
 0x54e   :  { %1001 = vrot.lane.b32.xlu1 %v966_v5, %s1633_s14  ;;  %998 = vrot.lane.b32.xlu0 %v966_v5, %s1636_s17 }
 0x552   :  { %1007 = vrot.lane.b32.xlu1 %v966_v5, %s1634_s15  ;;  %1004 = vrot.lane.b32.xlu0 %v966_v5, %s1631_s1 }
 0x556   :  { %1010 = vrot.lane.b32.xlu0 %v966_v5, %s1632_s13 }
 0x5ac   :  { %v972_v16 = vpop.permute.xlu1 %971  ;;  %v969_v17 = vpop.permute.xlu0 %968 }
 0x5ad   :  { %v1013_v18 = vsel %vm386_vm0, %v966_v5, %v969_v17 }
 0x5ae   :  { %v1014_v20 = vsel %vm388_vm1, %v1013_v18, %v972_v16 }
 0x5b0   :  { %v978_v19 = vpop.permute.xlu1 %977  ;;  %v975_v21 = vpop.permute.xlu0 %974 }
 0x5b1   :  { %v1015_v22 = vsel %vm390_vm2, %v1014_v20, %v975_v21 }
 0x5b2   :  { %v1016_v25 = vsel %vm392_vm3, %v1015_v22, %v978_v19 }
 0x5b4   :  { %v984_v23 = vpop.permute.xlu1 %983  ;;  %v981_v27 = vpop.permute.xlu0 %980 }
 0x5b5   :  { %v1017_v4 = vsel %vm394_vm4, %v1016_v25, %v981_v27 }
 0x5b6   :  { %v1018_v29 = vsel %vm396_vm5, %v1017_v4, %v984_v23 }
 0x5b8   :  { %v990_v28 = vpop.permute.xlu1 %989  ;;  %v987_v31 = vpop.permute.xlu0 %986 }
 0x5b9   :  { %v1019_v33 = vsel %vm398_vm6, %v1018_v29, %v987_v31 }
 0x5ba   :  { %v1020_v37 = vsel %vm400_vm7, %v1019_v33, %v990_v28 }
 0x5bc   :  { %v996_v34 = vpop.permute.xlu1 %995  ;;  %v993_v38 = vpop.permute.xlu0 %992 }
 0x5bd   :  { %v1021_v39 = vsel %vm402_vm8, %v1020_v37, %v993_v38 }
 0x5be   :  { %v1022_v44 = vsel %vm404_vm9, %v1021_v39, %v996_v34 }
 0x5c0   :  { %v1002_v40 = vpop.permute.xlu1 %1001  ;;  %v999_v43 = vpop.permute.xlu0 %998 }
 0x5c1   :  { %v1023_v46 = vsel %vm406_vm10, %v1022_v44, %v999_v43 }
 0x5c2   :  { %v1024_v47 = vsel %vm408_vm11, %v1023_v46, %v1002_v40  ;;  %v1111_v40 = vld [vmem:[%s2415_s5] sm:$0x1] }
 0x5c4   :  { %v1005_v48 = vpop.permute.xlu0 %1004  ;;  %v1008_v49 = vpop.permute.xlu1 %1007 }
 0x5c5   :  { %v1025_v51 = vsel %vm410_vm12, %v1024_v47, %v1005_v48 }
 0x5c6   :  { %v1026_v52 = vsel %vm412_vm13, %v1025_v51, %v1008_v49 }
 0x5c8   :  { %v1011_v53 = vpop.permute.xlu0 %1010 }
 0x5c9   :  { %v1027_v54 = vsel %vm414_vm14, %v1026_v52, %v1011_v53 }
 0x5ca   :  { %v1031_v59 = vrot.slane %v1027_v54, %v1897_v50 }
 0x5cc   :  { %v2256_v60 = vsub.f32 %v2197_v24, %v1031_v59  ;;  %v2259_v61 = vsub.f32 %v2199_v30, %v1031_v59  ;;  %v2262_v26 = vsub.f32 %v2201_v35, %v1031_v59  ;;  %v2265_v32 = vsub.f32 %v2206_v41, %v1031_v59 }
 0x5ce   :  { %v1036_v62 = vmul.f32 %v2256_v60, %v2256_v60  ;;  %v1037_v63 = vmul.f32 %v2259_v61, %v2259_v61  ;;  %v1038_v36 = vmul.f32 %v2262_v26, %v2262_v26  ;;  %v1039_v30 = vmul.f32 %v2265_v32, %v2265_v32 }
 0x5d0   :  { %v1040_v24 = vadd.f32 %v1037_v63, %v1036_v62 }
 0x5d2   :  { %v1041_v0 = vadd.f32 %v1040_v24, %v1038_v36 }
 0x5d4   :  { %v1042_v45 = vadd.f32 %v1041_v0, %v1039_v30 }
 0x5d6   :  { %v1043_v35 = vrot.slane %v1042_v45, 4 }
 0x5d8   :  { %v1044_v1 = vadd.f32 %v1043_v35, %v1042_v45 }
 0x5da   :  { %v1045_v42 = vrot.slane %v1044_v1, 2 }
 0x5dc   :  { %v1046_v41 = vadd.f32 %v1045_v42, %v1044_v1 }
 0x5de   :  { %v1047_v2 = vrot.slane %v1046_v41, 1 }
 0x5e0   :  { %v1048_v3 = vadd.f32 %v1047_v2, %v1046_v41 }
 0x5e2   :  { %1054 = vrot.lane.b32.xlu0 %v1048_v3, %s1634_s15  ;;  %1050 = vrot.lane.b32.xlu1 %v1048_v3, %s1632_s13 }
 0x5e6   :  { %1062 = vrot.lane.b32.xlu0 %v1048_v3, %s1633_s14  ;;  %1058 = vrot.lane.b32.xlu1 %v1048_v3, %s1631_s1 }
 0x5ea   :  { %1070 = vrot.lane.b32.xlu0 %v1048_v3, %s1635_s16  ;;  %1066 = vrot.lane.b32.xlu1 %v1048_v3, %s1636_s17 }
 0x5ee   :  { %1078 = vrot.lane.b32.xlu0 %v1048_v3, %s1637_s18  ;;  %1074 = vrot.lane.b32.xlu1 %v1048_v3, %s1638_s19 }
 0x5f2   :  { %1086 = vrot.lane.b32.xlu0 %v1048_v3, %s1639_s20  ;;  %1082 = vrot.lane.b32.xlu1 %v1048_v3, %s1640_s21 }
 0x5f6   :  { %1094 = vrot.lane.b32.xlu0 %v1048_v3, %s1641_s22  ;;  %1090 = vrot.lane.b32.xlu1 %v1048_v3, %s1642_s23 }
 0x5fa   :  { %1102 = vrot.lane.b32.xlu0 %v1048_v3, %s1643_s24  ;;  %1098 = vrot.lane.b32.xlu1 %v1048_v3, %s1644_s25 }
 0x5fe   :  { %1106 = vrot.lane.b32.xlu1 %v1048_v3, %s1645_s26 }
 0x602   :  { %1194 = vrot.lane.b32.xlu1 %v2296_v7, %s1645_s26 }
 0x606   :  { %1197 = vrot.lane.b32.xlu1 %v2296_v7, %s1643_s24 }
 0x60a   :  { %1200 = vrot.lane.b32.xlu1 %v2296_v7, %s1644_s25 }
 0x60e   :  { %1203 = vrot.lane.b32.xlu1 %v2296_v7, %s1641_s22 }
 0x612   :  { %1206 = vrot.lane.b32.xlu1 %v2296_v7, %s1642_s23 }
 0x616   :  { %1209 = vrot.lane.b32.xlu1 %v2296_v7, %s1639_s20 }
 0x61a   :  { %1212 = vrot.lane.b32.xlu1 %v2296_v7, %s1640_s21 }
 0x61e   :  { %1215 = vrot.lane.b32.xlu1 %v2296_v7, %s1637_s18 }
 0x622   :  { %1218 = vrot.lane.b32.xlu1 %v2296_v7, %s1638_s19 }
 0x626   :  { %1221 = vrot.lane.b32.xlu1 %v2296_v7, %s1635_s16 }
 0x654   :  { %v1055_v8 = vpop.permute.xlu0 %1054  ;;  %v1051_v9 = vpop.permute.xlu1 %1050 }
 0x655   :  { %v1053_v10 = vadd.f32 %v1051_v9, %v1048_v3 }
 0x657   :  { %v1057_v11 = vadd.f32 %v1055_v8, %v1053_v10 }
 0x658   :  { %v1063_v12 = vpop.permute.xlu0 %1062  ;;  %v1059_v13 = vpop.permute.xlu1 %1058 }
 0x659   :  { %v1061_v14 = vadd.f32 %v1059_v13, %v1057_v11 }
 0x65b   :  { %v1065_v15 = vadd.f32 %v1063_v12, %v1061_v14 }
 0x65c   :  { %v1071_v55 = vpop.permute.xlu0 %1070  ;;  %v1067_v56 = vpop.permute.xlu1 %1066 }
 0x65d   :  { %v1069_v57 = vadd.f32 %v1067_v56, %v1065_v15 }
 0x65f   :  { %v1073_v58 = vadd.f32 %v1071_v55, %v1069_v57 }
 0x660   :  { %v1079_v5 = vpop.permute.xlu0 %1078  ;;  %v1075_v16 = vpop.permute.xlu1 %1074 }
 0x661   :  { %v1077_v17 = vadd.f32 %v1075_v16, %v1073_v58 }
 0x663   :  { %v1081_v18 = vadd.f32 %v1079_v5, %v1077_v17 }
 0x664   :  { %v1087_v19 = vpop.permute.xlu0 %1086  ;;  %v1083_v20 = vpop.permute.xlu1 %1082 }
 0x665   :  { %v1085_v21 = vadd.f32 %v1083_v20, %v1081_v18 }
 0x667   :  { %v1089_v22 = vadd.f32 %v1087_v19, %v1085_v21 }
 0x668   :  { %v1095_v23 = vpop.permute.xlu0 %1094  ;;  %v1091_v25 = vpop.permute.xlu1 %1090 }
 0x669   :  { %v1093_v27 = vadd.f32 %v1091_v25, %v1089_v22 }
 0x66b   :  { %v1097_v4 = vadd.f32 %v1095_v23, %v1093_v27 }
 0x66c   :  { %v1099_v28 = vpop.permute.xlu1 %1098  ;;  %v1103_v31 = vpop.permute.xlu0 %1102 }
 0x66d   :  { %v1101_v29 = vadd.f32 %v1099_v28, %v1097_v4 }
 0x66f   :  { %v1105_v33 = vadd.f32 %v1103_v31, %v1101_v29 }
 0x670   :  { %v1107_v34 = vpop.permute.xlu1 %1106 }
 0x671   :  { %v1109_v37 = vadd.f32 %v1107_v34, %v1105_v33 }
 0x673   :  { %v1110_v38 = vmul.f32 0.001953125, %v1109_v37 }
 0x674   :  { %v1195_v47 = vpop.permute.xlu1 %1194 }
 0x675   :  { %v1112_v39 = vadd.f32 1e-05, %v1110_v38  ;;  %v1239_v0 = vsel %vm386_vm0, %v2292_v6, %v1195_v47 }
 0x677   :  { %1628 = vrsqrt.f32 %v1112_v39 }
 0x678   :  { %v1198_v48 = vpop.permute.xlu1 %1197 }
 0x679   :  { %v1240_v1 = vsel %vm388_vm1, %v1239_v0, %v1198_v48 }
 0x67c   :  { %v1201_v49 = vpop.permute.xlu1 %1200 }
 0x67d   :  { %v1241_v41 = vsel %vm390_vm2, %v1240_v1, %v1201_v49 }
 0x680   :  { %v1204_v51 = vpop.permute.xlu1 %1203 }
 0x681   :  { %v1629_v44 = vpop.eup %1628 }
 0x682   :  { %v1114_v43 = vmul.f32 %v1629_v44, %v1111_v40 }
 0x684   :  { %v1119_v46 = vrot.slane %v1114_v43, %v1897_v50  ;;  %v1207_v52 = vpop.permute.xlu1 %1206 }
 0x686   :  { %1123 = vrot.lane.b32.xlu1 %v1119_v46, %s1643_s24  ;;  %1120 = vrot.lane.b32.xlu0 %v1119_v46, %s1645_s26 }
 0x688   :  { %v1210_v54 = vpop.permute.xlu1 %1209 }
 0x68a   :  { %1126 = vrot.lane.b32.xlu0 %v1119_v46, %s1644_s25  ;;  %1224 = vrot.lane.b32.xlu1 %v2296_v7, %s1636_s17 }
 0x68c   :  { %v1213_v63 = vpop.permute.xlu1 %1212 }
 0x68e   :  { %1129 = vrot.lane.b32.xlu0 %v1119_v46, %s1641_s22  ;;  %1227 = vrot.lane.b32.xlu1 %v2296_v7, %s1633_s14 }
 0x690   :  { %v1216_v24 = vpop.permute.xlu1 %1215 }
 0x692   :  { %1132 = vrot.lane.b32.xlu0 %v1119_v46, %s1642_s23  ;;  %1230 = vrot.lane.b32.xlu1 %v2296_v7, %s1631_s1 }
 0x694   :  { %v1219_v35 = vpop.permute.xlu1 %1218 }
 0x696   :  { %1135 = vrot.lane.b32.xlu0 %v1119_v46, %s1639_s20  ;;  %1236 = vrot.lane.b32.xlu1 %v2296_v7, %s1632_s13 }
 0x698   :  { %v1222_v2 = vpop.permute.xlu1 %1221 }
 0x69a   :  { %1138 = vrot.lane.b32.xlu0 %v1119_v46, %s1640_s21 }
 0x69e   :  { %1141 = vrot.lane.b32.xlu0 %v1119_v46, %s1637_s18 }
 0x6a2   :  { %1144 = vrot.lane.b32.xlu0 %v1119_v46, %s1638_s19 }
 0x6a6   :  { %1147 = vrot.lane.b32.xlu0 %v1119_v46, %s1635_s16 }
 0x6aa   :  { %1150 = vrot.lane.b32.xlu0 %v1119_v46, %s1636_s17 }
 0x6ae   :  { %1153 = vrot.lane.b32.xlu0 %v1119_v46, %s1633_s14 }
 0x6b2   :  { %1156 = vrot.lane.b32.xlu0 %v1119_v46, %s1631_s1 }
 0x6b6   :  { %1159 = vrot.lane.b32.xlu0 %v1119_v46, %s1634_s15 }
 0x6ba   :  { %1162 = vrot.lane.b32.xlu0 %v1119_v46, %s1632_s13 }
 0x6be   :  { %1233 = vrot.lane.b32.xlu0 %v2296_v7, %s1634_s15  ;;  %v1242_v7 = vsel %vm392_vm3, %v1241_v41, %v1204_v51 }
 0x6bf   :  { %v1243_v8 = vsel %vm394_vm4, %v1242_v7, %v1207_v52 }
 0x6c0   :  { %v1244_v11 = vsel %vm396_vm5, %v1243_v8, %v1210_v54  ;;  %v892_v54 = vld [vmem:[%s2410_s0] sm:$0xff] }
 0x6c1   :  { %v1245_v13 = vsel %vm398_vm6, %v1244_v11, %v1213_v63 }
 0x6c2   :  { %v1246_v56 = vsel %vm400_vm7, %v1245_v13, %v1216_v24 }
 0x6c3   :  { %v1247_v16 = vsel %vm402_vm8, %v1246_v56, %v1219_v35 }
 0x6c4   :  { %v1248_v22 = vsel %vm404_vm9, %v1247_v16, %v1222_v2 }
 0x6f8   :  { %v1121_v53 = vpop.permute.xlu0 %1120  ;;  %v1124_v10 = vpop.permute.xlu1 %1123 }
 0x6f9   :  { %v1165_v6 = vsel %vm386_vm0, %v1114_v43, %v1121_v53 }
 0x6fa   :  { %v1166_v15 = vsel %vm388_vm1, %v1165_v6, %v1124_v10 }
 0x6fc   :  { %v1127_v59 = vpop.permute.xlu0 %1126  ;;  %v1225_v14 = vpop.permute.xlu1 %1224 }
 0x6fd   :  { %v1167_v57 = vsel %vm390_vm2, %v1166_v15, %v1127_v59  ;;  %v1249_v28 = vsel %vm406_vm10, %v1248_v22, %v1225_v14 }
 0x700   :  { %v1130_v62 = vpop.permute.xlu0 %1129  ;;  %v1228_v19 = vpop.permute.xlu1 %1227 }
 0x701   :  { %v1168_v58 = vsel %vm392_vm3, %v1167_v57, %v1130_v62  ;;  %v1250_v38 = vsel %vm408_vm11, %v1249_v28, %v1228_v19  ;;  %v893_v62 = vld [vmem:[%s2410_s0 + $0x8] sm:$0xff] }
 0x704   :  { %v1133_v36 = vpop.permute.xlu0 %1132  ;;  %v1231_v31 = vpop.permute.xlu1 %1230 }
 0x705   :  { %v1169_v5 = vsel %vm394_vm4, %v1168_v58, %v1133_v36  ;;  %v1251_v43 = vsel %vm410_vm12, %v1250_v38, %v1231_v31 }
 0x708   :  { %v1136_v30 = vpop.permute.xlu0 %1135  ;;  %v1237_v44 = vpop.permute.xlu1 %1236 }
 0x709   :  { %v1170_v17 = vsel %vm396_vm5, %v1169_v5, %v1136_v30 }
 0x70c   :  { %v1139_v45 = vpop.permute.xlu0 %1138 }
 0x70d   :  { %v1171_v20 = vsel %vm398_vm6, %v1170_v17, %v1139_v45 }
 0x710   :  { %v1142_v42 = vpop.permute.xlu0 %1141 }
 0x711   :  { %v1172_v21 = vsel %vm400_vm7, %v1171_v20, %v1142_v42 }
 0x714   :  { %v1145_v3 = vpop.permute.xlu0 %1144 }
 0x715   :  { %v1173_v23 = vsel %vm402_vm8, %v1172_v21, %v1145_v3 }
 0x718   :  { %v1148_v9 = vpop.permute.xlu0 %1147 }
 0x719   :  { %v1174_v25 = vsel %vm404_vm9, %v1173_v23, %v1148_v9 }
 0x71c   :  { %v1151_v12 = vpop.permute.xlu0 %1150 }
 0x71d   :  { %v1175_v4 = vsel %vm406_vm10, %v1174_v25, %v1151_v12 }
 0x720   :  { %v1154_v55 = vpop.permute.xlu0 %1153 }
 0x721   :  { %v1176_v29 = vsel %vm408_vm11, %v1175_v4, %v1154_v55 }
 0x724   :  { %v1157_v18 = vpop.permute.xlu0 %1156 }
 0x725   :  { %v1177_v33 = vsel %vm410_vm12, %v1176_v29, %v1157_v18 }
 0x728   :  { %v1160_v27 = vpop.permute.xlu0 %1159 }
 0x729   :  { %v1178_v34 = vsel %vm412_vm13, %v1177_v33, %v1160_v27 }
 0x72c   :  { %v1163_v37 = vpop.permute.xlu0 %1162 }
 0x72d   :  { %v1179_v39 = vsel %vm414_vm14, %v1178_v34, %v1163_v37 }
 0x72e   :  { %v1183_v40 = vrot.slane %v1179_v39, %v1897_v50 }
 0x730   :  { %v1234_v46 = vpop.permute.xlu0 %1233  ;;  %v1184_v48 = vmul.f32 %v1183_v40, %v2256_v60  ;;  %v1185_v51 = vmul.f32 %v1183_v40, %v2259_v61  ;;  %v1186_v52 = vmul.f32 %v1183_v40, %v2262_v26  ;;  %v1187_v53 = vmul.f32 %v1183_v40, %v2265_v32  ;;  %v894_v60 = vld [vmem:[%s2410_s0 + $0x10] sm:$0xff]  ;;  %v895_v61 = vld [vmem:[%s2410_s0 + $0x18] sm:$0xff] }
 0x731   :  { %v1252_v47 = vsel %vm412_vm13, %v1251_v43, %v1234_v46 }
 0x732   :  { %v1253_v49 = vsel %vm414_vm14, %v1252_v47, %v1237_v44 }
 0x733   :  { %v1257_v59 = vrot.slane %v1253_v49, %v1897_v50 }
 0x735   :  { %v1258_v26 = vadd.f32 %v1257_v59, %v1184_v48  ;;  %v1259_v32 = vadd.f32 %v1257_v59, %v1185_v51  ;;  %v1260_v63 = vadd.f32 %v1257_v59, %v1186_v52  ;;  %v1261_v36 = vadd.f32 %v1257_v59, %v1187_v53 }
 0x737   :  { %v1262_v24 = vadd.f32 %v1258_v26, %v892_v54  ;;  %v1263_v30 = vadd.f32 %v1259_v32, %v893_v62  ;;  %v1264_v0 = vadd.f32 %v1260_v63, %v894_v60  ;;  %v1265_v50 = vadd.f32 %v1261_v36, %v895_v61 }
 0x739   :  { %v1266_v45 = vmax.f32 %v1262_v24, 0.0  ;;  %v1267_v35 = vmax.f32 %v1263_v30, 0.0  ;;  %v1268_v1 = vmax.f32 %v1264_v0, 0.0  ;;  %v1269_v42 = vmax.f32 %v1265_v50, 0.0 }
 0x73b   :  { %1270 = vst [vmem:[%s2416_s7] sm:$0xff] %v1266_v45  ;;  %1271 = vst [vmem:[%s2416_s7 + $0x8] sm:$0xff] %v1267_v35 }
 0x73c   :  { %1272 = vst [vmem:[%s2416_s7 + $0x10] sm:$0xff] %v1268_v1  ;;  %1273 = vst [vmem:[%s2416_s7 + $0x18] sm:$0xff] %v1269_v42 }

</bundles_post_ra>
